<compile_context>
chip_gen: v6e
topology: v6e:2x2x1
jax: 0.10.0
libtpu: 0.0.40
codegen_flags: <defaults>
</compile_context>

<pallas_src>
import functools

import jax
import jax.numpy as jnp
from jax.experimental import pallas as pl
from jax.experimental.pallas import tpu as pltpu


def _deconv_phase_kernel(x_ref, halo_ref, w_ref, b_ref, o_ref, *, tm, W, Cin, Cop):
    """One (batch, row-tile) grid step of the phase-decomposed transposed conv.

    x_ref    : (1, tm, W+1, Cin)    input rows [r*tm, r*tm+tm), right col zero-padded
    halo_ref : (1, 1, W+1, Cin)     input row r*tm+tm (bottom halo; zeros at edge)
    w_ref    : (4*Cin, 4*Cop)       phase-fused ConvTranspose weight
    b_ref    : (1, 4*Cop)           phase-replicated (padded) bias
    o_ref    : (1, tm, 2, W, 2*Cop) output: (row, row-parity, col, col-parity*chan)
    """
    C2 = 2 * Cop
    lo = x_ref[0]                                     # x[m,   :, :]
    if tm > 1:                                        # x[m+1, :, :]: row shift + halo
        hi = jnp.concatenate((lo[1:], halo_ref[0]), axis=0)
    else:
        hi = halo_ref[0]
    lhs = jnp.concatenate(
        (lo[:, :W, :],                                # x[m,   n    ]
         lo[:, 1:, :],                                # x[m,   n + 1]
         hi[:, :W, :],                                # x[m+1, n    ]
         hi[:, 1:, :]),                               # x[m+1, n + 1]
        axis=-1).reshape(tm * W, 4 * Cin)
    # One fused MXU matmul producing all four output phases for this row tile.
    acc = jnp.dot(lhs, w_ref[...], preferred_element_type=jnp.float32)
    acc = acc + b_ref[...].astype(jnp.float32)
    # Phase columns are ordered (pr,pc) = (0,0)|(0,1)|(1,0)|(1,1): the two halves
    # are exactly the even / odd output rows, already pixel-shuffled along W.
    o_ref[0, :, 0, :, :] = acc[:, :C2].reshape(tm, W, C2).astype(o_ref.dtype)
    o_ref[0, :, 1, :, :] = acc[:, C2:].reshape(tm, W, C2).astype(o_ref.dtype)


def _vmem_budget_and_limit():
    """Per-generation (row-tile VMEM budget, scoped vmem_limit_bytes)."""
    try:
        cap = int(pltpu.get_tpu_info().vmem_capacity_bytes)
    except Exception:
        cap = 64 * 1024 * 1024
    if cap >= 96 * 1024 * 1024:                 # v5e / v6e: 128 MiB physical VMEM
        return 24 * 1024 * 1024, 64 * 1024 * 1024
    return 8 * 1024 * 1024, 32 * 1024 * 1024    # v7x: 64 MiB per TensorCore


def _pick_row_tile(N, H, Wp, W, Cin_p, C4, vmem_budget):
    """Largest VMEM-fitting row tile, split enough for both TCs / the pipeline."""
    b = 4  # f32 bytes
    per_row_vmem = b * (2 * Wp * Cin_p          # input block (double-buffered)
                        + Wp * Cin_p            # shifted-row temp (hi)
                        + 4 * W * Cin_p         # fused LHS temp
                        + 2 * W * C4            # output block (double-buffered)
                        + W * C4)               # f32 accumulator
    fixed_vmem = b * (2 * 4 * Cin_p * C4 + 2 * C4 + 4 * Wp * Cin_p)
    tm_vmem = max(1, (vmem_budget - fixed_vmem) // max(per_row_vmem, 1))
    per_row_hbm = b * (Wp * Cin_p + W * C4)     # read + write per output row
    tm_floor = max(1, (1 << 20) // max(per_row_hbm, 1))   # >= ~1 MiB HBM per step
    r_par = max(1, -(-8 // max(N, 1)))          # aim for >= 8 total grid steps
    tm_par = max(tm_floor, -(-H // r_par))
    tm = max(1, min(H, tm_vmem, tm_par))
    # Near-equal split (no tiny-divisor cliff); ragged tail handled by padding H.
    R = -(-H // tm)
    tm = -(-H // R)
    R = -(-H // tm)
    return tm, R


@functools.partial(jax.jit, static_argnums=(3, 4, 5, 6, 7))
def deconv_block_forward(x_nchw, weight, bias, output_size,
                         kernel=3, stride=2, padding=1, row_tile=None):
    """ConvTranspose2d forward matching PyTorch deconv_block semantics.

    x_nchw : (N, Cin, H, W)
    weight : (Cin, Cout, K, K)   -- PyTorch ConvTranspose2d weight layout
    bias   : (Cout,)
    output_size : (..., Ho, Wo) target spatial size passed to forward().
    """
    N, Cin, H, W = map(int, x_nchw.shape)
    wCin, Cout, KH, KW = map(int, weight.shape)
    K, s, p = int(kernel), int(stride), int(padding)
    assert wCin == Cin and KH == K and KW == K
    # Phase decomposition covers both link_net deconv configs: (3,2,1), (2,2,0).
    assert s == 2 and p <= 1 and K <= p + 2, "unsupported (kernel,stride,padding)"

    Ho, Wo = int(output_size[-2]), int(output_size[-1])
    base_h = (H - 1) * s - 2 * p + K
    base_w = (W - 1) * s - 2 * p + K
    op_h, op_w = Ho - base_h, Wo - base_w
    assert 0 <= op_h < s and 0 <= op_w < s, "invalid output_size"
    assert Ho <= 2 * H and Wo <= 2 * W

    dtype = x_nchw.dtype
    Cin_p = -(-Cin // 32) * 32            # lane-dense contraction (4*Cin_p % 128 == 0)
    Cout_p = -(-Cout // 32) * 32          # lane-dense output phases
    C4 = 4 * Cout_p
    C2 = 2 * Cout_p
    Wp = W + 1

    # ---- row tiling (per-generation VMEM budget; >= ~8 grid steps when cheap)
    vmem_budget, vmem_limit = _vmem_budget_and_limit()
    if row_tile is None:
        tm, R = _pick_row_tile(N, H, Wp, W, Cin_p, C4, vmem_budget)
    else:
        tm = max(1, min(int(row_tile), H))
        R = -(-H // tm)
    Hpad = R * tm

    # ---- glue (fused by jit): NHWC, channel pad, 1 col + (Hpad-H+1) row zero pad
    x = jnp.transpose(x_nchw, (0, 2, 3, 1))                          # (N, H, W, Cin)
    xpad = jnp.pad(x, ((0, 0), (0, Hpad + 1 - H), (0, 1), (0, Cin_p - Cin)))
    halo = xpad[:, tm::tm]                                           # (N, R, Wp, Cin_p)

    # ---- phase-fused weight (4*Cin_p, 4*Cout_p) and bias (1, 4*Cout_p)
    # y[2m+pr, 2n+pc] = sum_{dr,dc in {0,1}} x[m+dr, n+dc] @ W[:,:,kh,kw]
    # with kh = pr - 2*dr + p, kw = pc - 2*dc + p (tap exists iff 0 <= k < K).
    wbig = jnp.zeros((4 * Cin_p, C4), dtype=dtype)
    shifts = ((0, 0), (0, 1), (1, 0), (1, 1))                # matches lhs concat
    phases = ((0, 0), (0, 1), (1, 0), (1, 1))                # EE, EO, OE, OO
    for si, (dr, dc) in enumerate(shifts):
        for pi, (pr, pc) in enumerate(phases):
            kh = pr - 2 * dr + p
            kw = pc - 2 * dc + p
            if 0 <= kh < K and 0 <= kw < K:
                wbig = wbig.at[si * Cin_p:si * Cin_p + Cin,
                               pi * Cout_p:pi * Cout_p + Cout].set(
                    weight[:, :, kh, kw].astype(dtype))
    bias_p = jnp.zeros((Cout_p,), dtype=dtype).at[:Cout].set(bias.astype(dtype))
    bias_big = jnp.tile(bias_p, 4).reshape(1, C4)

    kern = functools.partial(_deconv_phase_kernel, tm=tm, W=W, Cin=Cin_p, Cop=Cout_p)
    flops = int(2 * N * Hpad * W * (4 * Cin_p) * C4)
    bytes_accessed = int(4 * (N * (Hpad + R) * Wp * Cin_p + 4 * Cin_p * C4 + C4
                              + N * Hpad * 2 * W * C2))

    out_ph = pl.pallas_call(
        kern,
        out_shape=jax.ShapeDtypeStruct((N, Hpad, 2, W, C2), dtype),
        grid_spec=pltpu.PrefetchScalarGridSpec(
            num_scalar_prefetch=0,
            grid=(N, R),
            in_specs=[
                pl.BlockSpec((1, tm, Wp, Cin_p), lambda n, r: (n, r, 0, 0)),
                pl.BlockSpec((1, 1, Wp, Cin_p), lambda n, r: (n, r, 0, 0)),
                pl.BlockSpec((4 * Cin_p, C4), lambda n, r: (0, 0)),
                pl.BlockSpec((1, C4), lambda n, r: (0, 0)),
            ],
            out_specs=pl.BlockSpec((1, tm, 2, W, C2), lambda n, r: (n, r, 0, 0, 0)),
        ),
        compiler_params=pltpu.CompilerParams(
            dimension_semantics=("parallel", "parallel"),
            vmem_limit_bytes=vmem_limit),
        cost_estimate=pl.CostEstimate(flops=flops, transcendentals=0,
                                      bytes_accessed=bytes_accessed),
    )(xpad, halo, wbig, bias_big)

    # ---- pure row-major reshape (pixel shuffle already done in-kernel), crop, NCHW
    y = out_ph.reshape(N, 2 * Hpad, 2 * W, Cout_p)
    y = y[:, :Ho, :Wo, :Cout]
    return jnp.transpose(y, (0, 3, 1, 2))                    # NCHW


def _reference(x_nchw, weight, bias, output_size, kernel=3, stride=2, padding=1):
    # Pure-JAX reference: conv_transpose == conv with lhs_dilation + flipped W.
    N, Cin, H, W = x_nchw.shape
    _, Cout, K, _ = weight.shape
    Ho, Wo = int(output_size[-2]), int(output_size[-1])
    op_h = Ho - ((H - 1) * stride - 2 * padding + K)
    op_w = Wo - ((W - 1) * stride - 2 * padding + K)
    w_oihw = jnp.transpose(weight[:, :, ::-1, ::-1], (1, 0, 2, 3))
    out = jax.lax.conv_general_dilated(
        x_nchw, w_oihw, window_strides=(1, 1),
        padding=[(K - 1 - padding, K - 1 - padding + op_h),
                 (K - 1 - padding, K - 1 - padding + op_w)],
        lhs_dilation=(stride, stride),
        dimension_numbers=("NCHW", "OIHW", "NCHW"))
    return out + bias[None, :, None, None]


if __name__ == "__main__":
    key = jax.random.PRNGKey(0)
    k_x, k_w, k_b, k_x2, k_w2, k_b2 = jax.random.split(key, 6)

    # Main config: deconv_block(4, 8) with defaults (kernel=3, stride=2, pad=1)
    N, Cin, Cout, H, W = 2, 4, 8, 16, 16
    x = jax.random.normal(k_x, (N, Cin, H, W), dtype=jnp.float32)
    weight = 0.1 * jax.random.normal(k_w, (Cin, Cout, 3, 3), dtype=jnp.float32)
    bias = 0.1 * jax.random.normal(k_b, (Cout,), dtype=jnp.float32)

    # output_padding = 1 (as used throughout link_net) and 0 (crop path).
    for out_size in ((2 * H, 2 * W), (2 * H - 1, 2 * W - 1)):
        out = jax.block_until_ready(
            deconv_block_forward(x, weight, bias, out_size, 3, 2, 1))
        ref = _reference(x, weight, bias, out_size, 3, 2, 1)
        assert out.shape == (N, Cout, out_size[0], out_size[1]), out.shape
        assert jnp.allclose(out, ref, atol=1e-4, rtol=1e-4), \
            float(jnp.max(jnp.abs(out - ref)))

    # Multi-row-tile + ragged tail path (forced row_tile=5 -> R=4, Hpad=20 > H).
    out_mt = jax.block_until_ready(
        deconv_block_forward(x, weight, bias, (2 * H, 2 * W), 3, 2, 1, 5))
    ref_mt = _reference(x, weight, bias, (2 * H, 2 * W), 3, 2, 1)
    assert jnp.allclose(out_mt, ref_mt, atol=1e-4, rtol=1e-4), \
        float(jnp.max(jnp.abs(out_mt - ref_mt)))

    # Second link_net config: deconv_block(32, category, 2, 2, 0) (toy 8 -> 11)
    Cin2, Cout2 = 8, 11
    x2 = jax.random.normal(k_x2, (N, Cin2, H, W), dtype=jnp.float32)
    w2 = 0.1 * jax.random.normal(k_w2, (Cin2, Cout2, 2, 2), dtype=jnp.float32)
    b2 = 0.1 * jax.random.normal(k_b2, (Cout2,), dtype=jnp.float32)
    out2 = jax.block_until_ready(
        deconv_block_forward(x2, w2, b2, (2 * H, 2 * W), 2, 2, 0))
    ref2 = _reference(x2, w2, b2, (2 * H, 2 * W), 2, 2, 0)
    assert out2.shape == (N, Cout2, 2 * H, 2 * W), out2.shape
    assert jnp.allclose(out2, ref2, atol=1e-4, rtol=1e-4), \
        float(jnp.max(jnp.abs(out2 - ref2)))

    print("KERNEL_OK")
</pallas_src>

<mosaic_0001>
module attributes {stable_mosaic.version = 11 : i64} {
  func.func @_deconv_phase_kernel(%arg0: i32, %arg1: i32, %arg2: memref<1x16x17x32xf32, #tpu.memory_space<vmem>>, %arg3: memref<1x1x17x32xf32, #tpu.memory_space<vmem>>, %arg4: memref<128x128xf32, #tpu.memory_space<vmem>>, %arg5: memref<1x128xf32, #tpu.memory_space<vmem>>, %arg6: memref<1x16x2x16x64xf32, #tpu.memory_space<vmem>>) attributes {dimension_semantics = [#tpu.dimension_semantics<parallel>, #tpu.dimension_semantics<parallel>], iteration_bounds = array<i64: 2, 1>, scalar_prefetch = 0 : i64, scratch_operands = 0 : i64, tpu.core_type = #tpu.core_type<tc>, window_params = [{transform_indices = @transform_0, window_bounds = array<i64: 1, 16, 17, 32>}, {transform_indices = @transform_1, window_bounds = array<i64: 1, 1, 17, 32>}, {pipeline_mode = #tpu.pipeline_mode<synchronous>, transform_indices = @transform_2, window_bounds = array<i64: 128, 128>}, {pipeline_mode = #tpu.pipeline_mode<synchronous>, transform_indices = @transform_3, window_bounds = array<i64: 1, 128>}, {transform_indices = @transform_4, window_bounds = array<i64: 1, 16, 2, 16, 64>}]} {
    %c0 = arith.constant 0 : index
    %c0_0 = arith.constant 0 : index
    %c0_1 = arith.constant 0 : index
    %c0_2 = arith.constant 0 : index
    %0 = vector.load %arg2[%c0, %c0_0, %c0_1, %c0_2] : memref<1x16x17x32xf32, #tpu.memory_space<vmem>>, vector<1x16x17x32xf32>
    %1 = vector.shape_cast %0 : vector<1x16x17x32xf32> to vector<16x17x32xf32>
    %2 = vector.extract_strided_slice %1 {offsets = [1, 0, 0], sizes = [15, 17, 32], strides = [1, 1, 1]} : vector<16x17x32xf32> to vector<15x17x32xf32>
    %c0_3 = arith.constant 0 : index
    %c0_4 = arith.constant 0 : index
    %c0_5 = arith.constant 0 : index
    %c0_6 = arith.constant 0 : index
    %3 = vector.load %arg3[%c0_3, %c0_4, %c0_5, %c0_6] : memref<1x1x17x32xf32, #tpu.memory_space<vmem>>, vector<1x1x17x32xf32>
    %4 = vector.shape_cast %3 : vector<1x1x17x32xf32> to vector<1x17x32xf32>
    %5 = tpu.concatenate %2, %4 in 0 : vector<15x17x32xf32>, vector<1x17x32xf32> -> vector<16x17x32xf32>
    %6 = vector.extract_strided_slice %1 {offsets = [0, 0, 0], sizes = [16, 16, 32], strides = [1, 1, 1]} : vector<16x17x32xf32> to vector<16x16x32xf32>
    %7 = vector.extract_strided_slice %1 {offsets = [0, 1, 0], sizes = [16, 16, 32], strides = [1, 1, 1]} : vector<16x17x32xf32> to vector<16x16x32xf32>
    %8 = vector.extract_strided_slice %5 {offsets = [0, 0, 0], sizes = [16, 16, 32], strides = [1, 1, 1]} : vector<16x17x32xf32> to vector<16x16x32xf32>
    %9 = vector.extract_strided_slice %5 {offsets = [0, 1, 0], sizes = [16, 16, 32], strides = [1, 1, 1]} : vector<16x17x32xf32> to vector<16x16x32xf32>
    %10 = tpu.concatenate %6, %7, %8, %9 in 2 : vector<16x16x32xf32>, vector<16x16x32xf32>, vector<16x16x32xf32>, vector<16x16x32xf32> -> vector<16x16x128xf32>
    %11 = vector.shape_cast %10 : vector<16x16x128xf32> to vector<256x128xf32>
    %c0_7 = arith.constant 0 : index
    %c0_8 = arith.constant 0 : index
    %12 = vector.load %arg4[%c0_7, %c0_8] : memref<128x128xf32, #tpu.memory_space<vmem>>, vector<128x128xf32>
    %cst = arith.constant dense<0.000000e+00> : vector<256x128xf32>
    %13 = tpu.matmul %11, %12, %cst {dimension_numbers = #tpu.dot_dimension_numbers<[1], [0], [0], [1], [0, 0, 1, 1], [], []>} : vector<256x128xf32>, vector<128x128xf32>, vector<256x128xf32> -> vector<256x128xf32>
    %c0_9 = arith.constant 0 : index
    %c0_10 = arith.constant 0 : index
    %14 = vector.load %arg5[%c0_9, %c0_10] : memref<1x128xf32, #tpu.memory_space<vmem>>, vector<1x128xf32>
    %15 = vector.broadcast %14 : vector<1x128xf32> to vector<256x128xf32>
    %16 = arith.addf %13, %15 : vector<256x128xf32>
    %17 = vector.extract_strided_slice %16 {offsets = [0, 0], sizes = [256, 64], strides = [1, 1]} : vector<256x128xf32> to vector<256x64xf32>
    %18 = vector.shape_cast %17 : vector<256x64xf32> to vector<16x16x64xf32>
    %c0_11 = arith.constant 0 : index
    %c0_12 = arith.constant 0 : index
    %c0_13 = arith.constant 0 : index
    %c0_14 = arith.constant 0 : index
    %c0_15 = arith.constant 0 : index
    %19 = vector.load %arg6[%c0_11, %c0_12, %c0_13, %c0_14, %c0_15] : memref<1x16x2x16x64xf32, #tpu.memory_space<vmem>>, vector<1x16x1x16x64xf32>
    %20 = vector.shape_cast %19 : vector<1x16x1x16x64xf32> to vector<16x16x64xf32>
    %21 = vector.shape_cast %18 : vector<16x16x64xf32> to vector<1x16x1x16x64xf32>
    tpu.vector_store %arg6[%c0_11, %c0_12, %c0_13, %c0_14, %c0_15], %21 {strides = array<i32>} : memref<1x16x2x16x64xf32, #tpu.memory_space<vmem>>, vector<1x16x1x16x64xf32>,
    %22 = vector.extract_strided_slice %16 {offsets = [0, 64], sizes = [256, 64], strides = [1, 1]} : vector<256x128xf32> to vector<256x64xf32>
    %23 = vector.shape_cast %22 : vector<256x64xf32> to vector<16x16x64xf32>
    %c0_16 = arith.constant 0 : index
    %c0_17 = arith.constant 0 : index
    %c1 = arith.constant 1 : index
    %c0_18 = arith.constant 0 : index
    %c0_19 = arith.constant 0 : index
    %24 = vector.load %arg6[%c0_16, %c0_17, %c1, %c0_18, %c0_19] : memref<1x16x2x16x64xf32, #tpu.memory_space<vmem>>, vector<1x16x1x16x64xf32>
    %25 = vector.shape_cast %24 : vector<1x16x1x16x64xf32> to vector<16x16x64xf32>
    %26 = vector.shape_cast %23 : vector<16x16x64xf32> to vector<1x16x1x16x64xf32>
    tpu.vector_store %arg6[%c0_16, %c0_17, %c1, %c0_18, %c0_19], %26 {strides = array<i32>} : memref<1x16x2x16x64xf32, #tpu.memory_space<vmem>>, vector<1x16x1x16x64xf32>,
    return
  }
  func.func @transform_0(%arg0: i32, %arg1: i32) -> (i32, i32, i32, i32) {
    %c0_i32 = arith.constant 0 : i32
    %c0_i32_0 = arith.constant 0 : i32
    %c0_i32_1 = arith.constant 0 : i32
    return %arg0, %arg1, %c0_i32, %c0_i32_0 : i32, i32, i32, i32
  }
  func.func @transform_1(%arg0: i32, %arg1: i32) -> (i32, i32, i32, i32) {
    %c0_i32 = arith.constant 0 : i32
    %c0_i32_0 = arith.constant 0 : i32
    %c0_i32_1 = arith.constant 0 : i32
    return %arg0, %arg1, %c0_i32, %c0_i32_0 : i32, i32, i32, i32
  }
  func.func @transform_2(%arg0: i32, %arg1: i32) -> (i32, i32) {
    %c0_i32 = arith.constant 0 : i32
    %c0_i32_0 = arith.constant 0 : i32
    %c0_i32_1 = arith.constant 0 : i32
    return %c0_i32, %c0_i32_0 : i32, i32
  }
  func.func @transform_3(%arg0: i32, %arg1: i32) -> (i32, i32) {
    %c0_i32 = arith.constant 0 : i32
    %c0_i32_0 = arith.constant 0 : i32
    %c0_i32_1 = arith.constant 0 : i32
    return %c0_i32, %c0_i32_0 : i32, i32
  }
  func.func @transform_4(%arg0: i32, %arg1: i32) -> (i32, i32, i32, i32, i32) {
    %c0_i32 = arith.constant 0 : i32
    %c0_i32_0 = arith.constant 0 : i32
    %c0_i32_1 = arith.constant 0 : i32
    %c0_i32_2 = arith.constant 0 : i32
    return %arg0, %arg1, %c0_i32, %c0_i32_0, %c0_i32_1 : i32, i32, i32, i32, i32
  }
}

</mosaic_0001>

<bundles_post_ra>
// kernel: tile.8
= control target key start
LH: loop header
LB: loop body
LE: loop exit
PB: predicated region body
PF: predicated region fallthrough
CT: control target
= control target key end

     0   :  { %s22_s0 = inlined_call_operand.vmem [shape: f32[32], index: 0, kind: input, shape index: {}]   ;;  %s23_s1 = inlined_call_operand.vmem [shape: f32[4,32], index: 1, kind: output, shape index: {}]  }
   0x1   :  { %v4_v0 = vld [vmem:[%s22_s0] ss:$0 sm:$0xff] }
   0x2   :  { %5 = vst [vmem:[%s23_s1] sm:$0xf] %v4_v0 }

// kernel: tile.9
= control target key start
LH: loop header
LB: loop body
LE: loop exit
PB: predicated region body
PF: predicated region fallthrough
CT: control target
= control target key end

     0   :  { %vm8_vm0 = vcmask 261120   ;;  %s40_s8 = smov 32   ;;  %s41_s9 = smov 64   ;;  %vm14_vm1 = vcmask 1048320   ;;  %vm20_vm2 = vcmask 785920   ;;  %vm26_vm3 = vcmask 523520   ;;  %s58_s0 = inlined_call_operand.vmem [shape: f32[4,32], index: 0, kind: input, shape index: {}]   ;;  %s59_s1 = inlined_call_operand.vmem [shape: f32[1,128], index: 1, kind: output, shape index: {}]  }
   0x1   :  { %v5_v0 = vld [vmem:[%s58_s0] sm:$0xf]  ;;  %s39_s0 = smov 96  }
   0x2   :  { %6 = vst [vmem:[#allocation1] sm:$0xf] %v5_v0 }
   0x9   :  { %v11_v1 = vld [vmem:[#allocation1 + $0x3] sm:$0x1]   ;;  %v23_v2 = vld [vmem:[#allocation1 + $0x1] sm:$0x1]   ;;  %v7_v3 = vld [vmem:[#allocation1] sm:$0x1]  }
   0xa   :  { %12 = vrot.lane.b32.xlu0 %v11_v1, %s39_s0  ;;  %24 = vrot.lane.b32.xlu1 %v23_v2, %s40_s8  ;;  %v17_v4 = vld [vmem:[#allocation1 + $0x2] sm:$0x1]   ;;  %9 = vst.msk [vmem:[#allocation0] sm:$0x1] %vm8_vm0, %v7_v3  }
   0xe   :  { %18 = vrot.lane.b32.xlu0 %v17_v4, %s41_s9 }
  0x7c   :  { %v13_v5 = vpop.permute.xlu0 %12   ;;  %v25_v6 = vpop.permute.xlu1 %24  }
  0x7d   :  { %15 = vst.msk [vmem:[#allocation0] sm:$0x1] %vm14_vm1, %v13_v5  }
  0x80   :  { %v19_v7 = vpop.permute.xlu0 %18  }
  0x81   :  { %21 = vst.msk [vmem:[#allocation0] sm:$0x1] %vm20_vm2, %v19_v7  }
  0x82   :  { %27 = vst.msk [vmem:[#allocation0] sm:$0x1] %vm26_vm3, %v25_v6  }
  0x89   :  { %v32_v8 = vld [vmem:[#allocation0] sm:$0x1] }
  0x8a   :  { %35 = vst [vmem:[%s59_s1] sm:$0x1] %v32_v8 }

// kernel: deconv_block_forward.1
= control target key start
LH: loop header
LB: loop body
LE: loop exit
PB: predicated region body
PF: predicated region fallthrough
CT: control target
= control target key end

     0   :  { %s1960_s15 = smov 0   ;;  %s1962_s16 = smov 0   ;;  %s2683_s0 = inlined_call_operand.vmem [shape: f32[2,17,17,32], index: 0, kind: input, shape index: {}]   ;;  %s2684_s1 = inlined_call_operand.vmem [shape: f32[2,1,17,32], index: 1, kind: input, shape index: {}]   ;;  %s2685_s2 = inlined_call_operand.vmem [shape: f32[128,128], index: 2, kind: input, shape index: {}]   ;;  %s2686_s3 = inlined_call_operand.vmem [shape: f32[1,128], index: 3, kind: input, shape index: {}]   ;;  %s2687_s4 = inlined_call_operand.vmem [shape: f32[2,16,2,16,64], index: 4, kind: output, shape index: {}]  }
   0x1   :  { %s1964_s17 = smov 0  }
   0x2 LB: > { %s26_s18 = sadd.s32 1, %s1926_s16  ;;  %p1438_p0 = scmp.ge.s32.totalorder %s1930_s17, 1  ;;  %s1930_s17 = sphi %s1964_s17, %s14_s17   ;;  %s1926_s16 = sphi %s1962_s16, %s2689_s16   ;;  %s1922_s15 = sphi %s1960_s15, %s2688_s15  }
   0x3   : > { %p28_p1 = scmp.ge.s32.totalorder %s26_s18, 2  ;;  %p210_p2 = scmp.lt.s32.totalorder %s1930_s17, 3 }
   0x5   : > { %s2691_s18 = smov (%p28_p1, %s26_s18), 0  ;;  %p211_p3 = pnand %p1438_p0, %p210_p2 }
   0x6   : > { %p266_p4 = scmp.lt.s32.totalorder (!%p211_p3), %s1922_s15, 1  ;;  %s1932_s19 = smov (!%p211_p3), 64  }
   0x7   : > { %214 = sbr.rel (%p211_p3) target bundleno = 555 (0x22b), region = 36  ;;  %s1933_s22 = smov (!%p211_p3), 32  }
   0x8   : > { %s1934_s23 = smov (!%p211_p3), 96  }
   0xc   : > { %v891_v0 = vld [vmem:[%s2685_s2 + $0x78] sm:$0xff]  ;;  %v890_v1 = vld [vmem:[%s2685_s2 + $0x70] sm:$0xff]  ;;  %s2693_s15 = smov (!%p266_p4, %s1922_s15), 1  ;;  %v889_v2 = vld [vmem:[%s2685_s2 + $0x68] sm:$0xff]  ;;  %vm400_vm0 = vcmask 1046528   ;;  %vm777_vm1 = vcmask 261120  }
   0xd   : > { %1527 = vmatprep.subr.mxu0 %v891_v0  ;;  %1607 = vmatprep.subr.mxu1 %v891_v0  ;;  %s1639_s25 = smul.u32 408, %s2693_s15  ;;  %v888_v3 = vld [vmem:[%s2685_s2 + $0x60] sm:$0xff]  ;;  %v887_v4 = vld [vmem:[%s2685_s2 + $0x58] sm:$0xff]  ;;  %v886_v5 = vld [vmem:[%s2685_s2 + $0x50] sm:$0xff]  ;;  %vm810_vm2 = vcmask 523264   ;;  %vm843_vm3 = vcmask 785408  }
   0xe   : > { %1528 = vmatpush3.msra.mxu0 %v891_v0  ;;  %1623 = vmatpush3.msra.mxu1 %v891_v0  ;;  %s1640_s28 = smul.u32 24, %s2693_s15  ;;  %v885_v16 = vld [vmem:[%s2685_s2 + $0x48] sm:$0xff]  ;;  %v884_v44 = vld [vmem:[%s2685_s2 + $0x40] sm:$0xff]  ;;  %v883_v56 = vld [vmem:[%s2685_s2 + $0x38] sm:$0xff] }
   0xf   : > { %1529 = vmatprep.subr.mxu0 %v890_v1  ;;  %1608 = vmatprep.subr.mxu1 %v890_v1  ;;  %s1997_s5 = scalar_lea.vmem %s2683_s0, %s1639_s25  ;;  %v882_v63 = vld [vmem:[%s2685_s2 + $0x30] sm:$0xff] }
  0x10   : > { %1530 = vmatpush3.msra.mxu0 %v890_v1  ;;  %1624 = vmatpush3.msra.mxu1 %v890_v1  ;;  %v2006_v6 = vld [vmem:[%s1997_s5 + $0x18] sm:$0xff]  ;;  %s2014_s12 = scalar_lea.vmem %s2684_s1, %s1640_s28  ;;  %v2017_v8 = vld [vmem:[%s1997_s5 + $0xc0] sm:$0xff]  ;;  %v2024_v12 = vld [vmem:[%s1997_s5 + $0xc8] sm:$0xff] }
  0x11   : > { %1531 = vmatprep.subr.mxu0 %v889_v2  ;;  %1609 = vmatprep.subr.mxu1 %v889_v2  ;;  %v2009_v7 = vld [vmem:[%s1997_s5 + $0xd8] sm:$0xff]  ;;  %v406_v11 = vrot.slane %v2006_v6, 1  ;;  %v2027_v13 = vld [vmem:[%s2014_s12] sm:$0xff]  ;;  %v2030_v14 = vld [vmem:[%s2014_s12 + $0x8] sm:$0xff]  ;;  %v441_v15 = vrot.slane %v2017_v8, 1  ;;  %v442_v17 = vrot.slane %v2024_v12, 1 }
  0x12   : > { %1532 = vmatpush3.msra.mxu0 %v889_v2  ;;  %1625 = vmatpush3.msra.mxu1 %v889_v2  ;;  %v446_v9 = vrot.slane %v2009_v7, 1  ;;  %v1668_v10 = vpack.i.bf16 %v2009_v7, %v2006_v6  ;;  %v676_v18 = vrot.slane %v2027_v13, 1  ;;  %v677_v19 = vrot.slane %v2030_v14, 1  ;;  %v2040_v20 = vld [vmem:[%s1997_s5] sm:$0xff]  ;;  %v2043_v21 = vld [vmem:[%s1997_s5 + $0x8] sm:$0xff]  ;;  %v2087_v48 = vld [vmem:[%s1997_s5 + $0xf8] sm:$0xff] }
  0x13   : > { %1533 = vmatprep.subr.mxu0 %v888_v3  ;;  %1610 = vmatprep.subr.mxu1 %v888_v3  ;;  %v2046_v22 = vld [vmem:[%s1997_s5 + $0x20] sm:$0xff]  ;;  %v401_v23 = vrot.slane %v2040_v20, 1  ;;  %v402_v24 = vrot.slane %v2043_v21, 1  ;;  %v303_v27 = vld [vmem:[%s1997_s5 + $0x10] sm:$0x1]  ;;  %v2057_v28 = vsel %vm400_vm0, %v441_v15, %v442_v17  ;;  %v2092_v52 = vld [vmem:[%s1997_s5 + $0x38] sm:$0xff] }
  0x14   : > { %1534 = vmatpush3.msra.mxu0 %v888_v3  ;;  %1626 = vmatpush3.msra.mxu1 %v888_v3  ;;  %v2052_v25 = vld [vmem:[%s1997_s5 + $0xe0] sm:$0xff]  ;;  %v407_v26 = vrot.slane %v2046_v22, 1  ;;  %v2062_v29 = vsel %vm400_vm0, %v676_v18, %v677_v19  ;;  %v327_v32 = vld [vmem:[%s1997_s5 + $0xd0] sm:$0x1]  ;;  %v306_v33 = vld [vmem:[%s1997_s5 + $0x28] sm:$0x1]  ;;  %v1713_v0 = vpack.i.bf16 %v2087_v48, %v2092_v52 }
  0x15   : > { %1535 = vmatprep.subr.mxu0 %v887_v4  ;;  %1611 = vmatprep.subr.mxu1 %v887_v4  ;;  %v447_v30 = vrot.slane %v2052_v25, 1  ;;  %v1673_v31 = vpack.i.bf16 %v2052_v25, %v2046_v22  ;;  %v1898_v34 = vpack.i.bf16 %v2062_v29, %v2057_v28  ;;  %v403_v35 = vsel %vm400_vm0, %v401_v23, %v402_v24  ;;  %v330_v38 = vld [vmem:[%s1997_s5 + $0xe8] sm:$0x1]  ;;  %v309_v53 = vld [vmem:[%s1997_s5 + $0x40] sm:$0x1]  ;;  %v2104_v61 = vld [vmem:[%s1997_s5 + $0x30] sm:$0xff] }
  0x16   : > { %1669 = vrot.lane.b32.xlu1 %v1668_v10, %s1932_s19  ;;  %1536 = vmatpush3.msra.mxu0 %v887_v4  ;;  %v404_v36 = vrot.slane %v303_v27, 1  ;;  %v444_v37 = vrot.slane %v327_v32, 1  ;;  %v1678_v39 = vpack.i.bf16 %v2057_v28, %v403_v35  ;;  %v409_v40 = vrot.slane %v306_v33, 1  ;;  %v333_v54 = vld [vmem:[%s1997_s5 + $0x100] sm:$0x1]  ;;  %v2107_v62 = vld [vmem:[%s1997_s5 + $0xf0] sm:$0xff] }
  0x17   : > { %1627 = vmatpush3.msra.mxu1 %v887_v4  ;;  %1537 = vmatprep.subr.mxu0 %v886_v5  ;;  %v449_v41 = vrot.slane %v330_v38, 1  ;;  %v408_v50 = vsel %vm400_vm0, %v406_v11, %v407_v26  ;;  %v448_v51 = vsel %vm400_vm0, %v446_v9, %v447_v30  ;;  %v452_v55 = vrot.slane %v2087_v48, 1  ;;  %v2128_v11 = vld [vmem:[%s1997_s5 + $0x110] sm:$0xff]  ;;  %v880_v15 = vld [vmem:[%s2685_s2 + $0x20] sm:$0xff]  ;;  %v312_v23 = vld [vmem:[%s1997_s5 + $0x58] sm:$0x1] }
  0x18   : > { %1612 = vmatprep.subr.mxu1 %v886_v5  ;;  %1538 = vmatpush3.msra.mxu0 %v886_v5  ;;  %v405_v42 = vsel %vm400_vm0, %v402_v24, %v404_v36  ;;  %v2077_v43 = vsel %vm400_vm0, %v442_v17, %v444_v37  ;;  %v410_v46 = vsel %vm400_vm0, %v407_v26, %v409_v40  ;;  %v412_v58 = vrot.slane %v2092_v52, 1  ;;  %v2136_v18 = vld [vmem:[%s1997_s5 + $0x50] sm:$0xff]  ;;  %v336_v24 = vld [vmem:[%s1997_s5 + $0x118] sm:$0x1]  ;;  %v2148_v35 = vld [vmem:[%s1997_s5 + $0x48] sm:$0xff] }
  0x19   : > { %1628 = vmatpush3.msra.mxu1 %v886_v5  ;;  %1539 = vmatprep.subr.mxu0 %v885_v16  ;;  %v1683_v45 = vpack.i.bf16 %v2077_v43, %v405_v42  ;;  %v450_v47 = vsel %vm400_vm0, %v447_v30, %v449_v41  ;;  %v1688_v57 = vpack.i.bf16 %v448_v51, %v408_v50  ;;  %v414_v59 = vrot.slane %v309_v53, 1  ;;  %v881_v5 = vld [vmem:[%s2685_s2 + $0x28] sm:$0xff]  ;;  %v879_v27 = vld [vmem:[%s2685_s2 + $0x18] sm:$0xff]  ;;  %v2154_v37 = vld [vmem:[%s1997_s5 + $0xb0] sm:$0xff] }
  0x1a   : > { %1674 = vrot.lane.b32.xlu1 %v1673_v31, %s1932_s19  ;;  %1613 = vmatprep.subr.mxu1 %v885_v16  ;;  %v1693_v49 = vpack.i.bf16 %v450_v47, %v410_v46  ;;  %v454_v60 = vrot.slane %v333_v54, 1  ;;  %v451_v3 = vrot.slane %v2107_v62, 1  ;;  %v411_v4 = vrot.slane %v2104_v61, 1  ;;  %v2151_v36 = vld [vmem:[%s1997_s5 + $0x108] sm:$0xff]  ;;  %v2157_v38 = vld [vmem:[%s1997_s5 + $0x170] sm:$0xff] }
  0x1b   : > { %1679 = vrot.lane.b32.xlu0 %v1678_v39, %s1933_s22  ;;  %1540 = vmatpush3.msra.mxu0 %v885_v16  ;;  %v415_v1 = vsel %vm400_vm0, %v412_v58, %v414_v59  ;;  %v1708_v10 = vpack.i.bf16 %v2107_v62, %v2104_v61  ;;  %v457_v26 = vrot.slane %v2128_v11, 1  ;;  %v417_v31 = vrot.slane %v2136_v18, 1  ;;  %v878_v40 = vld [vmem:[%s2685_s2 + $0x10] sm:$0xff]  ;;  %v877_v53 = vld [vmem:[%s2685_s2 + $0x8] sm:$0xff] }
  0x1c   : > { %1629 = vmatpush3.msra.mxu1 %v885_v16  ;;  %1541 = vmatprep.subr.mxu0 %v884_v44  ;;  %v455_v2 = vsel %vm400_vm0, %v452_v55, %v454_v60  ;;  %v413_v16 = vsel %vm400_vm0, %v411_v4, %v412_v58  ;;  %v453_v17 = vsel %vm400_vm0, %v451_v3, %v452_v55  ;;  %v419_v32 = vrot.slane %v312_v23, 1  ;;  %v351_v46 = vld [vmem:[%s2014_s12 + $0x10] sm:$0x1]  ;;  %v2183_v59 = vld [vmem:[%s1997_s5 + $0x68] sm:$0xff] }
  0x1d   : > { %1614 = vmatprep.subr.mxu1 %v884_v44  ;;  %1542 = vmatpush3.msra.mxu0 %v884_v44  ;;  %v1723_v9 = vpack.i.bf16 %v455_v2, %v415_v1  ;;  %v1718_v30 = vpack.i.bf16 %v453_v17, %v413_v16  ;;  %v459_v33 = vrot.slane %v336_v24, 1  ;;  %v1743_v39 = vpack.i.bf16 %v2128_v11, %v2136_v18  ;;  %v2186_v60 = vld [vmem:[%s1997_s5 + $0x128] sm:$0xff]  ;;  %v315_v1 = vld [vmem:[%s1997_s5 + $0x70] sm:$0x1] }
  0x1e   : > { %1694 = vrot.lane.b32.xlu1 %v1693_v49, %s1934_s23  ;;  %1630 = vmatpush3.msra.mxu1 %v884_v44  ;;  %v420_v41 = vsel %vm400_vm0, %v417_v31, %v419_v32  ;;  %v324_v44 = vld [vmem:[%s1997_s5 + $0xb8] sm:$0x1]  ;;  %v456_v47 = vrot.slane %v2151_v36, 1  ;;  %v477_v50 = vrot.slane %v2157_v38, 1  ;;  %v437_v51 = vrot.slane %v2154_v37, 1 }
  0x1f   : > { %1684 = vrot.lane.b32.xlu0 %v1683_v45, %s1933_s22  ;;  %1543 = vmatprep.subr.mxu0 %v883_v56  ;;  %v460_v42 = vsel %vm400_vm0, %v457_v26, %v459_v33  ;;  %v348_v45 = vld [vmem:[%s1997_s5 + $0x178] sm:$0x1]  ;;  %v439_v55 = vrot.slane %v324_v44, 1  ;;  %v1738_v58 = vpack.i.bf16 %v2151_v36, %v2148_v35  ;;  %v339_v2 = vld [vmem:[%s1997_s5 + $0x130] sm:$0x1]  ;;  %v422_v23 = vrot.slane %v2183_v59, 1 }
  0x20   : > { %1615 = vmatprep.subr.mxu1 %v883_v56  ;;  %1544 = vmatpush3.msra.mxu0 %v883_v56  ;;  %v1753_v54 = vpack.i.bf16 %v460_v42, %v420_v41  ;;  %v424_v24 = vrot.slane %v315_v1, 1  ;;  %v2233_v42 = vld [vmem:[%s1997_s5 + $0x140] sm:$0xff] }
  0x21   : > { %1631 = vmatpush3.msra.mxu1 %v883_v56  ;;  %1545 = vmatprep.subr.mxu0 %v882_v63  ;;  %v479_v56 = vrot.slane %v348_v45, 1  ;;  %v440_v3 = vsel %vm400_vm0, %v437_v51, %v439_v55 }
  0x22   : > { %1704 = vrot.lane.b32.xlu1 %v1693_v49, %s1933_s22  ;;  %1616 = vmatprep.subr.mxu1 %v882_v63  ;;  %v416_v49 = vrot.slane %v2148_v35, 1 }
  0x23   : > { %1689 = vrot.lane.b32.xlu0 %v1688_v57, %s1934_s23  ;;  %1546 = vmatpush3.msra.mxu0 %v882_v63  ;;  %v480_v4 = vsel %vm400_vm0, %v477_v50, %v479_v56 }
  0x24   : > { %1632 = vmatpush3.msra.mxu1 %v882_v63  ;;  %1547 = vmatprep.subr.mxu0 %v881_v5  ;;  %v418_v63 = vsel %vm400_vm0, %v416_v49, %v417_v31  ;;  %v425_v31 = vsel %vm400_vm0, %v422_v23, %v424_v24  ;;  %v342_v49 = vld [vmem:[%s1997_s5 + $0x148] sm:$0x1] }
  0x25   : > { %1617 = vmatprep.subr.mxu1 %v881_v5  ;;  %1548 = vmatpush3.msra.mxu0 %v881_v5 }
  0x26   : > { %1714 = vrot.lane.b32.xlu1 %v1713_v0, %s1932_s19  ;;  %1633 = vmatpush3.msra.mxu1 %v881_v5  ;;  %v458_v0 = vsel %vm400_vm0, %v456_v47, %v457_v26  ;;  %v876_v5 = vld [vmem:[%s2685_s2] sm:$0xff]  ;;  %v464_v26 = vrot.slane %v339_v2, 1  ;;  %v318_v47 = vld [vmem:[%s1997_s5 + $0x88] sm:$0x1] }
  0x27   : > { %1699 = vrot.lane.b32.xlu0 %v1688_v57, %s1933_s22  ;;  %1549 = vmatprep.subr.mxu0 %v880_v15  ;;  %v679_v57 = vrot.slane %v351_v46, 1  ;;  %v1748_v17 = vpack.i.bf16 %v458_v0, %v418_v63  ;;  %v2238_v46 = vld [vmem:[%s1997_s5 + $0x80] sm:$0xff]  ;;  %v429_v56 = vrot.slane %v318_v47, 1  ;;  %v2250_v63 = vld [vmem:[%s1997_s5 + $0x138] sm:$0xff] }
  0x28   : > { %1618 = vmatprep.subr.mxu1 %v880_v15  ;;  %1550 = vmatpush3.msra.mxu0 %v880_v15  ;;  %v427_v55 = vrot.slane %v2238_v46, 1  ;;  %v1803_v0 = vpack.i.bf16 %v2233_v42, %v2238_v46 }
  0x29   : > { %1634 = vmatpush3.msra.mxu1 %v880_v15  ;;  %1551 = vmatprep.subr.mxu0 %v879_v27  ;;  %v462_v15 = vrot.slane %v2186_v60, 1 }
  0x2a   : > { %1724 = vrot.lane.b32.xlu1 %v1723_v9, %s1934_s23  ;;  %1619 = vmatprep.subr.mxu1 %v879_v27  ;;  %v430_v1 = vsel %vm400_vm0, %v427_v55, %v429_v56 }
  0x2b   : > { %1709 = vrot.lane.b32.xlu0 %v1708_v10, %s1932_s19  ;;  %1552 = vmatpush3.msra.mxu0 %v879_v27  ;;  %v2206_v10 = vsel %vm400_vm0, %v677_v19, %v679_v57  ;;  %v2215_v19 = vld [vmem:[%s1997_s5 + $0x60] sm:$0xff]  ;;  %v465_v32 = vsel %vm400_vm0, %v462_v15, %v464_v26  ;;  %v469_v57 = vrot.slane %v342_v49, 1  ;;  %v2270_v26 = vld [vmem:[%s1997_s5 + $0x98] sm:$0xff] }
  0x2c   : > { %1635 = vmatpush3.msra.mxu1 %v879_v27  ;;  %1553 = vmatprep.subr.mxu0 %v878_v40  ;;  %v1903_v16 = vpack.i.bf16 %v2206_v10, %v2077_v43  ;;  %v2218_v27 = vld [vmem:[%s1997_s5 + $0x120] sm:$0xff] }
  0x2d   : > { %1620 = vmatprep.subr.mxu1 %v878_v40  ;;  %1554 = vmatpush3.msra.mxu0 %v878_v40  ;;  %v461_v33 = vrot.slane %v2218_v27, 1  ;;  %v1768_v41 = vpack.i.bf16 %v2218_v27, %v2215_v19 }
  0x2e   : > { %1734 = vrot.lane.b32.xlu1 %v1723_v9, %s1933_s22  ;;  %1636 = vmatpush3.msra.mxu1 %v878_v40  ;;  %v2201_v9 = vpack.i.bf16 %v480_v4, %v440_v3  ;;  %v1783_v40 = vpack.i.bf16 %v465_v32, %v425_v31  ;;  %v466_v3 = vrot.slane %v2250_v63, 1  ;;  %v345_v31 = vld [vmem:[%s1997_s5 + $0x160] sm:$0x1] }
  0x2f   : > { %1719 = vrot.lane.b32.xlu0 %v1718_v30, %s1934_s23  ;;  %1555 = vmatprep.subr.mxu0 %v877_v53  ;;  %v463_v45 = vsel %vm400_vm0, %v461_v33, %v462_v15 }
  0x30   : > { %1621 = vmatprep.subr.mxu1 %v877_v53  ;;  %1556 = vmatpush3.msra.mxu0 %v877_v53 }
  0x31   : > { %1637 = vmatpush3.msra.mxu1 %v877_v53  ;;  %1557 = vmatprep.subr.mxu0 %v876_v5  ;;  %v467_v53 = vrot.slane %v2233_v42, 1 }
  0x32   : > { %1744 = vrot.lane.b32.xlu1 %v1743_v39, %s1932_s19  ;;  %1622 = vmatprep.subr.mxu1 %v876_v5  ;;  %v421_v39 = vrot.slane %v2215_v19, 1 }
  0x33   : > { %1729 = vrot.lane.b32.xlu0 %v1718_v30, %s1933_s22  ;;  %1558 = vmatpush3.msra.mxu0 %v876_v5  ;;  %v1773_v30 = vpack.i.bf16 %v2186_v60, %v2183_v59  ;;  %v470_v2 = vsel %vm400_vm0, %v467_v53, %v469_v57  ;;  %v468_v24 = vsel %vm400_vm0, %v466_v3, %v467_v53  ;;  %v2301_v3 = vld [vmem:[%s1997_s5 + $0xa8] sm:$0xff] }
  0x34   : > { %1638 = vmatpush3.msra.mxu1 %v876_v5  ;;  %v423_v44 = vsel %vm400_vm0, %v421_v39, %v422_v23  ;;  %v1813_v5 = vpack.i.bf16 %v470_v2, %v430_v1  ;;  %v432_v39 = vrot.slane %v2270_v26, 1 }
  0x36   : > { %1754 = vrot.lane.b32.xlu1 %v1753_v54, %s1934_s23 }
  0x37   : > { %1739 = vrot.lane.b32.xlu0 %v1738_v58, %s1932_s19  ;;  %v2247_v58 = vld [vmem:[%s1997_s5 + $0x78] sm:$0xff] }
  0x38   : > { %v426_v4 = vrot.slane %v2247_v58, 1  ;;  %v1798_v15 = vpack.i.bf16 %v2250_v63, %v2247_v58 }
  0x3a   : > { %1764 = vrot.lane.b32.xlu1 %v1753_v54, %s1933_s22  ;;  %v1778_v54 = vpack.i.bf16 %v463_v45, %v423_v44  ;;  %v428_v23 = vsel %vm400_vm0, %v426_v4, %v427_v55  ;;  %v2279_v44 = vld [vmem:[%s1997_s5 + $0x90] sm:$0xff]  ;;  %v2304_v4 = vld [vmem:[%s1997_s5 + $0x168] sm:$0xff] }
  0x3b   : > { %1749 = vrot.lane.b32.xlu0 %v1748_v17, %s1934_s23  ;;  %v1808_v33 = vpack.i.bf16 %v468_v24, %v428_v23  ;;  %v2282_v45 = vld [vmem:[%s1997_s5 + $0x150] sm:$0xff]  ;;  %v431_v55 = vrot.slane %v2279_v44, 1  ;;  %v436_v23 = vrot.slane %v2301_v3, 1  ;;  %v1858_v24 = vpack.i.bf16 %v2304_v4, %v2301_v3 }
  0x3c   : > { %v1828_v57 = vpack.i.bf16 %v2282_v45, %v2279_v44 }
  0x3e   : > { %1774 = vrot.lane.b32.xlu1 %v1773_v30, %s1932_s19  ;;  %v321_v30 = vld [vmem:[%s1997_s5 + $0xa0] sm:$0x1] }
  0x3f   : > { %1759 = vrot.lane.b32.xlu0 %v1748_v17, %s1933_s22  ;;  %v2265_v17 = vld [vmem:[%s1997_s5 + $0x158] sm:$0xff]  ;;  %s1478_s5 = sshll.u32 %s2693_s15, 9 }
  0x40   : > { %v472_v32 = vrot.slane %v2265_v17, 1  ;;  %v1833_v47 = vpack.i.bf16 %v2265_v17, %v2270_v26  ;;  %s2480_s24 = scalar_lea.vmem %s2687_s4, %s1478_s5 }
  0x42   : > { %1784 = vrot.lane.b32.xlu1 %v1783_v40, %s1934_s23 }
  0x43   : > { %1769 = vrot.lane.b32.xlu0 %v1768_v41, %s1932_s19  ;;  %v474_v41 = vrot.slane %v345_v31, 1 }
  0x45   : > { %v475_v53 = vsel %vm400_vm0, %v472_v32, %v474_v41 }
  0x46   : > { %1794 = vrot.lane.b32.xlu1 %v1783_v40, %s1933_s22  ;;  %v434_v40 = vrot.slane %v321_v30, 1  ;;  %v438_v30 = vsel %vm400_vm0, %v436_v23, %v437_v51 }
  0x47   : > { %1779 = vrot.lane.b32.xlu0 %v1778_v54, %s1934_s23 }
  0x48   : > { %v435_v49 = vsel %vm400_vm0, %v432_v39, %v434_v40 }
  0x49   : > { %v1843_v56 = vpack.i.bf16 %v475_v53, %v435_v49 }
  0x4a   : > { %1804 = vrot.lane.b32.xlu1 %v1803_v0, %s1932_s19  ;;  %v433_v0 = vsel %vm400_vm0, %v431_v55, %v432_v39 }
  0x4b   : > { %1789 = vrot.lane.b32.xlu0 %v1778_v54, %s1933_s22  ;;  %v471_v54 = vrot.slane %v2282_v45, 1 }
  0x4d   : > { %v473_v1 = vsel %vm400_vm0, %v471_v54, %v472_v32 }
  0x4e   : > { %1814 = vrot.lane.b32.xlu1 %v1813_v5, %s1934_s23  ;;  %v1838_v2 = vpack.i.bf16 %v473_v1, %v433_v0 }
  0x4f   : > { %1799 = vrot.lane.b32.xlu0 %v1798_v15, %s1932_s19  ;;  %v476_v15 = vrot.slane %v2304_v4, 1 }
  0x51   : > { %v478_v31 = vsel %vm400_vm0, %v476_v15, %v477_v50  ;;  %v1888_v50 = vpack.i.bf16 %v2027_v13, %v2017_v8 }
  0x52   : > { %1824 = vrot.lane.b32.xlu1 %v1813_v5, %s1933_s22  ;;  %v1863_v5 = vpack.i.bf16 %v2157_v38, %v2154_v37  ;;  %v1868_v32 = vpack.i.bf16 %v478_v31, %v438_v30 }
  0x53   : > { %1809 = vrot.lane.b32.xlu0 %v1808_v33, %s1934_s23 }
  0x56   : > { %1834 = vrot.lane.b32.xlu1 %v1833_v47, %s1932_s19 }
  0x57   : > { %1819 = vrot.lane.b32.xlu0 %v1808_v33, %s1933_s22  ;;  %v1893_v33 = vpack.i.bf16 %v2030_v14, %v2024_v12 }
  0x5a   : > { %1844 = vrot.lane.b32.xlu1 %v1843_v56, %s1934_s23 }
  0x5b   : > { %1829 = vrot.lane.b32.xlu0 %v1828_v57, %s1932_s19 }
  0x5e   : > { %1854 = vrot.lane.b32.xlu1 %v1843_v56, %s1933_s22 }
  0x5f   : > { %1839 = vrot.lane.b32.xlu0 %v1838_v2, %s1934_s23 }
  0x62   : > { %1864 = vrot.lane.b32.xlu1 %v1863_v5, %s1932_s19 }
  0x63   : > { %1849 = vrot.lane.b32.xlu0 %v1838_v2, %s1933_s22 }
  0x66   : > { %1874 = vrot.lane.b32.xlu1 %v2201_v9, %s1934_s23 }
  0x67   : > { %1859 = vrot.lane.b32.xlu0 %v1858_v24, %s1932_s19 }
  0x6a   : > { %1884 = vrot.lane.b32.xlu1 %v2201_v9, %s1933_s22 }
  0x6b   : > { %1869 = vrot.lane.b32.xlu0 %v1868_v32, %s1934_s23 }
  0x6e   : > { %1894 = vrot.lane.b32.xlu1 %v1893_v33, %s1932_s19 }
  0x6f   : > { %1879 = vrot.lane.b32.xlu0 %v1868_v32, %s1933_s22 }
  0x72   : > { %1904 = vrot.lane.b32.xlu1 %v1903_v16, %s1934_s23 }
  0x73   : > { %1889 = vrot.lane.b32.xlu0 %v1888_v50, %s1932_s19 }
  0x77   : > { %1899 = vrot.lane.b32.xlu0 %v1898_v34, %s1934_s23 }
  0x88   : > { %v1670_v14 = vpop.permute.xlu1 %1669 }
  0x89   : > { %v1672_v10 = vunpack.i.h.bf16 %v1670_v14  ;;  %v1671_v16 = vunpack.i.l.bf16 %v1670_v14 }
  0x8c   : > { %v1675_v51 = vpop.permute.xlu1 %1674 }
  0x8d   : > { %v1680_v9 = vpop.permute.xlu0 %1679  ;;  %v1677_v13 = vunpack.i.h.bf16 %v1675_v51  ;;  %v1676_v49 = vunpack.i.l.bf16 %v1675_v51 }
  0x8e   : > { %v1682_v39 = vunpack.i.h.bf16 %v1680_v9  ;;  %v1681_v40 = vunpack.i.l.bf16 %v1680_v9 }
  0x90   : > { %v1695_v41 = vpop.permute.xlu1 %1694  ;;  %v778_v28 = vsel %vm777_vm1, %v2040_v20, %v1681_v40  ;;  %v794_v29 = vsel %vm777_vm1, %v2017_v8, %v1682_v39 }
  0x91   : > { %v1685_v47 = vpop.permute.xlu0 %1684  ;;  %v1697_v56 = vunpack.i.h.bf16 %v1695_v41  ;;  %v1696_v57 = vunpack.i.l.bf16 %v1695_v41  ;;  %v811_v20 = vsel %vm810_vm2, %v778_v28, %v1671_v16  ;;  %v827_v8 = vsel %vm810_vm2, %v794_v29, %v1672_v10 }
  0x92   : > { %v1687_v53 = vunpack.i.h.bf16 %v1685_v47  ;;  %v1686_v43 = vunpack.i.l.bf16 %v1685_v47 }
  0x94   : > { %v1705_v54 = vpop.permute.xlu1 %1704  ;;  %v779_v34 = vsel %vm777_vm1, %v2043_v21, %v1686_v43  ;;  %v795_v55 = vsel %vm777_vm1, %v2024_v12, %v1687_v53 }
  0x95   : > { %v1690_v0 = vpop.permute.xlu0 %1689  ;;  %v812_v5 = vsel %vm810_vm2, %v779_v34, %v1676_v49  ;;  %v828_v15 = vsel %vm810_vm2, %v795_v55, %v1677_v13  ;;  %v1707_v33 = vunpack.i.h.bf16 %v1705_v54  ;;  %v1706_v50 = vunpack.i.l.bf16 %v1705_v54 }
  0x96   : > { %v1692_v1 = vunpack.i.h.bf16 %v1690_v0  ;;  %v1691_v2 = vunpack.i.l.bf16 %v1690_v0  ;;  %v845_v30 = vsel %vm843_vm3, %v812_v5, %v1696_v57  ;;  %v861_v31 = vsel %vm843_vm3, %v828_v15, %v1697_v56 }
  0x97   : > { %v781_v10 = vsel %vm777_vm1, %v2046_v22, %v1706_v50  ;;  %v797_v16 = vsel %vm777_vm1, %v2052_v25, %v1707_v33 }
  0x98   : > { %v844_v23 = vsel %vm843_vm3, %v811_v20, %v1691_v2  ;;  %v860_v21 = vsel %vm843_vm3, %v827_v8, %v1692_v1  ;;  %v1715_v24 = vpop.permute.xlu1 %1714 }
  0x99   : > { %v1700_v12 = vpop.permute.xlu0 %1699  ;;  %1559 = vmatprep.mubr.f32.mxu0 %v844_v23  ;;  %1583 = vmatprep.mubr.f32.mxu1 %v860_v21  ;;  %v1717_v41 = vunpack.i.h.bf16 %v1715_v24  ;;  %v1716_v47 = vunpack.i.l.bf16 %v1715_v24 }
  0x9a   : > { %1560 = vmatmul.mubr.f32.vlgmr.msra.gmra.mxu0 %v845_v30  ;;  %1584 = vmatmul.mubr.f32.vlgmr.msra.gmra.mxu1 %v861_v31  ;;  %v1702_v51 = vunpack.i.h.bf16 %v1700_v12  ;;  %v1701_v9 = vunpack.i.l.bf16 %v1700_v12 }
  0x9b   : > { %v814_v1 = vsel %vm810_vm2, %v781_v10, %v1716_v47  ;;  %v830_v25 = vsel %vm810_vm2, %v797_v16, %v1717_v41 }
  0x9c   : > { %v1725_v32 = vpop.permute.xlu1 %1724  ;;  %v780_v54 = vsel %vm777_vm1, %v2006_v6, %v1701_v9  ;;  %v796_v34 = vsel %vm777_vm1, %v2009_v7, %v1702_v51 }
  0x9d   : > { %v1710_v14 = vpop.permute.xlu0 %1709  ;;  %v1727_v49 = vunpack.i.h.bf16 %v1725_v32  ;;  %v1726_v53 = vunpack.i.l.bf16 %v1725_v32 }
  0x9e   : > { %v1712_v39 = vunpack.i.h.bf16 %v1710_v14  ;;  %v1711_v40 = vunpack.i.l.bf16 %v1710_v14 }
  0x9f   : > { %v847_v6 = vsel %vm843_vm3, %v814_v1, %v1726_v53  ;;  %v863_v7 = vsel %vm843_vm3, %v830_v25, %v1727_v49 }
  0xa0   : > { %v1735_v13 = vpop.permute.xlu1 %1734  ;;  %v813_v55 = vsel %vm810_vm2, %v780_v54, %v1711_v40  ;;  %v829_v56 = vsel %vm810_vm2, %v796_v34, %v1712_v39 }
  0xa1   : > { %v1720_v43 = vpop.permute.xlu0 %1719  ;;  %v1737_v15 = vunpack.i.h.bf16 %v1735_v13  ;;  %v1736_v20 = vunpack.i.l.bf16 %v1735_v13 }
  0xa2   : > { %v1722_v28 = vunpack.i.h.bf16 %v1720_v43  ;;  %v1721_v29 = vunpack.i.l.bf16 %v1720_v43 }
  0xa3   : > { %v783_v51 = vsel %vm777_vm1, %v2092_v52, %v1736_v20  ;;  %v799_v9 = vsel %vm777_vm1, %v2087_v48, %v1737_v15 }
  0xa4   : > { %v846_v57 = vsel %vm843_vm3, %v813_v55, %v1721_v29  ;;  %v862_v0 = vsel %vm843_vm3, %v829_v56, %v1722_v28  ;;  %v1745_v22 = vpop.permute.xlu1 %1744 }
  0xa5   : > { %v1730_v2 = vpop.permute.xlu0 %1729  ;;  %1562 = vmatprep.mubr.f32.mxu0 %v846_v57  ;;  %1586 = vmatprep.mubr.f32.mxu1 %v862_v0  ;;  %v1747_v30 = vunpack.i.h.bf16 %v1745_v22  ;;  %v1746_v31 = vunpack.i.l.bf16 %v1745_v22 }
  0xa6   : > { %1563 = vmatmul.mubr.f32.gmra.mxu0 %v847_v6  ;;  %1587 = vmatmul.mubr.f32.gmra.mxu1 %v863_v7  ;;  %v1732_v23 = vunpack.i.h.bf16 %v1730_v2  ;;  %v1731_v21 = vunpack.i.l.bf16 %v1730_v2 }
  0xa7   : > { %v816_v10 = vsel %vm810_vm2, %v783_v51, %v1746_v31  ;;  %v832_v48 = vsel %vm810_vm2, %v799_v9, %v1747_v30 }
  0xa8   : > { %v1755_v5 = vpop.permute.xlu1 %1754  ;;  %v782_v41 = vsel %vm777_vm1, %v2104_v61, %v1731_v21  ;;  %v798_v47 = vsel %vm777_vm1, %v2107_v62, %v1732_v23 }
  0xa9   : > { %v1740_v8 = vpop.permute.xlu0 %1739  ;;  %v1757_v33 = vunpack.i.h.bf16 %v1755_v5  ;;  %v1756_v50 = vunpack.i.l.bf16 %v1755_v5 }
  0xaa   : > { %v1742_v24 = vunpack.i.h.bf16 %v1740_v8  ;;  %v1741_v12 = vunpack.i.l.bf16 %v1740_v8 }
  0xab   : > { %v849_v61 = vsel %vm843_vm3, %v816_v10, %v1756_v50  ;;  %v865_v62 = vsel %vm843_vm3, %v832_v48, %v1757_v33 }
  0xac   : > { %v1765_v32 = vpop.permute.xlu1 %1764  ;;  %v815_v13 = vsel %vm810_vm2, %v782_v41, %v1741_v12  ;;  %v831_v49 = vsel %vm810_vm2, %v798_v47, %v1742_v24 }
  0xad   : > { %v1750_v14 = vpop.permute.xlu0 %1749  ;;  %v1767_v29 = vunpack.i.h.bf16 %v1765_v32  ;;  %v1766_v54 = vunpack.i.l.bf16 %v1765_v32 }
  0xae   : > { %v1752_v39 = vunpack.i.h.bf16 %v1750_v14  ;;  %v1751_v40 = vunpack.i.l.bf16 %v1750_v14 }
  0xaf   : > { %v785_v5 = vsel %vm777_vm1, %v2136_v18, %v1766_v54  ;;  %v801_v15 = vsel %vm777_vm1, %v2128_v11, %v1767_v29 }
  0xb0   : > { %v848_v53 = vsel %vm843_vm3, %v815_v13, %v1751_v40  ;;  %v864_v43 = vsel %vm843_vm3, %v831_v49, %v1752_v39  ;;  %v1775_v52 = vpop.permute.xlu1 %1774 }
  0xb1   : > { %v1760_v16 = vpop.permute.xlu0 %1759  ;;  %1565 = vmatprep.mubr.f32.mxu0 %v848_v53  ;;  %1589 = vmatprep.mubr.f32.mxu1 %v864_v43  ;;  %v1777_v22 = vunpack.i.h.bf16 %v1775_v52  ;;  %v1776_v1 = vunpack.i.l.bf16 %v1775_v52 }
  0xb2   : > { %1566 = vmatmul.mubr.f32.gmra.mxu0 %v849_v61  ;;  %1590 = vmatmul.mubr.f32.gmra.mxu1 %v865_v62  ;;  %v1762_v55 = vunpack.i.h.bf16 %v1760_v16  ;;  %v1761_v56 = vunpack.i.l.bf16 %v1760_v16 }
  0xb3   : > { %v818_v32 = vsel %vm810_vm2, %v785_v5, %v1776_v1  ;;  %v834_v11 = vsel %vm810_vm2, %v801_v15, %v1777_v22 }
  0xb4   : > { %v1785_v28 = vpop.permute.xlu1 %1784  ;;  %v784_v23 = vsel %vm777_vm1, %v2148_v35, %v1761_v56  ;;  %v800_v21 = vsel %vm777_vm1, %v2151_v36, %v1762_v55 }
  0xb5   : > { %v1770_v34 = vpop.permute.xlu0 %1769  ;;  %v1787_v2 = vunpack.i.h.bf16 %v1785_v28  ;;  %v1786_v6 = vunpack.i.l.bf16 %v1785_v28 }
  0xb6   : > { %v1772_v57 = vunpack.i.h.bf16 %v1770_v34  ;;  %v1771_v0 = vunpack.i.l.bf16 %v1770_v34 }
  0xb7   : > { %v851_v35 = vsel %vm843_vm3, %v818_v32, %v1786_v6  ;;  %v867_v36 = vsel %vm843_vm3, %v834_v11, %v1787_v2 }
  0xb8   : > { %v1795_v25 = vpop.permute.xlu1 %1794  ;;  %v817_v24 = vsel %vm810_vm2, %v784_v23, %v1771_v0  ;;  %v833_v12 = vsel %vm810_vm2, %v800_v21, %v1772_v57 }
  0xb9   : > { %v1780_v7 = vpop.permute.xlu0 %1779  ;;  %v1797_v14 = vunpack.i.h.bf16 %v1795_v25  ;;  %v1796_v51 = vunpack.i.l.bf16 %v1795_v25 }
  0xba   : > { %v1782_v20 = vunpack.i.h.bf16 %v1780_v7  ;;  %v1781_v8 = vunpack.i.l.bf16 %v1780_v7 }
  0xbb   : > { %v787_v48 = vsel %vm777_vm1, %v2183_v59, %v1796_v51  ;;  %v803_v16 = vsel %vm777_vm1, %v2186_v60, %v1797_v14 }
  0xbc   : > { %v850_v30 = vsel %vm843_vm3, %v817_v24, %v1781_v8  ;;  %v866_v31 = vsel %vm843_vm3, %v833_v12, %v1782_v20  ;;  %v1805_v18 = vpop.permute.xlu1 %1804 }
  0xbd   : > { %v1790_v33 = vpop.permute.xlu0 %1789  ;;  %1568 = vmatprep.mubr.f32.mxu0 %v850_v30  ;;  %1592 = vmatprep.mubr.f32.mxu1 %v866_v31  ;;  %v1807_v13 = vunpack.i.h.bf16 %v1805_v18  ;;  %v1806_v49 = vunpack.i.l.bf16 %v1805_v18 }
  0xbe   : > { %1569 = vmatmul.mubr.f32.gmra.mxu0 %v851_v35  ;;  %1593 = vmatmul.mubr.f32.gmra.mxu1 %v867_v36  ;;  %v1792_v39 = vunpack.i.h.bf16 %v1790_v33  ;;  %v1791_v40 = vunpack.i.l.bf16 %v1790_v33 }
  0xbf   : > { %v820_v57 = vsel %vm810_vm2, %v787_v48, %v1806_v49  ;;  %v836_v60 = vsel %vm810_vm2, %v803_v16, %v1807_v13 }
  0xc0   : > { %v1815_v50 = vpop.permute.xlu1 %1814  ;;  %v786_v28 = vsel %vm777_vm1, %v2215_v19, %v1791_v40  ;;  %v802_v29 = vsel %vm777_vm1, %v2218_v27, %v1792_v39 }
  0xc1   : > { %v1800_v9 = vpop.permute.xlu0 %1799  ;;  %v1817_v43 = vunpack.i.h.bf16 %v1815_v50  ;;  %v1816_v52 = vunpack.i.l.bf16 %v1815_v50 }
  0xc2   : > { %v1802_v41 = vunpack.i.h.bf16 %v1800_v9  ;;  %v1801_v47 = vunpack.i.l.bf16 %v1800_v9 }
  0xc3   : > { %v853_v19 = vsel %vm843_vm3, %v820_v57, %v1816_v52  ;;  %v869_v27 = vsel %vm843_vm3, %v836_v60, %v1817_v43 }
  0xc4   : > { %v1825_v53 = vpop.permute.xlu1 %1824  ;;  %v819_v54 = vsel %vm810_vm2, %v786_v28, %v1801_v47  ;;  %v835_v34 = vsel %vm810_vm2, %v802_v29, %v1802_v41 }
  0xc5   : > { %v1810_v10 = vpop.permute.xlu0 %1809  ;;  %v1827_v1 = vunpack.i.h.bf16 %v1825_v53  ;;  %v1826_v25 = vunpack.i.l.bf16 %v1825_v53 }
  0xc6   : > { %v1812_v61 = vunpack.i.h.bf16 %v1810_v10  ;;  %v1811_v62 = vunpack.i.l.bf16 %v1810_v10 }
  0xc7   : > { %v789_v30 = vsel %vm777_vm1, %v2238_v46, %v1826_v25  ;;  %v805_v31 = vsel %vm777_vm1, %v2233_v42, %v1827_v1 }
  0xc8   : > { %v852_v55 = vsel %vm843_vm3, %v819_v54, %v1811_v62  ;;  %v868_v56 = vsel %vm843_vm3, %v835_v34, %v1812_v61  ;;  %v1835_v59 = vpop.permute.xlu1 %1834 }
  0xc9   : > { %v1820_v0 = vpop.permute.xlu0 %1819  ;;  %1571 = vmatprep.mubr.f32.mxu0 %v852_v55  ;;  %1595 = vmatprep.mubr.f32.mxu1 %v868_v56  ;;  %v1837_v20 = vunpack.i.h.bf16 %v1835_v59  ;;  %v1836_v8 = vunpack.i.l.bf16 %v1835_v59 }
  0xca   : > { %1572 = vmatmul.mubr.f32.gmra.mxu0 %v853_v19  ;;  %1596 = vmatmul.mubr.f32.gmra.mxu1 %v869_v27  ;;  %v1822_v6 = vunpack.i.h.bf16 %v1820_v0  ;;  %v1821_v7 = vunpack.i.l.bf16 %v1820_v0 }
  0xcb   : > { %v822_v51 = vsel %vm810_vm2, %v789_v30, %v1836_v8  ;;  %v838_v42 = vsel %vm810_vm2, %v805_v31, %v1837_v20 }
  0xcc   : > { %v1845_v22 = vpop.permute.xlu1 %1844  ;;  %v788_v11 = vsel %vm777_vm1, %v2247_v58, %v1821_v7  ;;  %v804_v33 = vsel %vm777_vm1, %v2250_v63, %v1822_v6 }
  0xcd   : > { %v1830_v2 = vpop.permute.xlu0 %1829  ;;  %v1847_v21 = vunpack.i.h.bf16 %v1845_v22  ;;  %v1846_v24 = vunpack.i.l.bf16 %v1845_v22 }
  0xce   : > { %v1832_v5 = vunpack.i.h.bf16 %v1830_v2  ;;  %v1831_v15 = vunpack.i.l.bf16 %v1830_v2 }
  0xcf   : > { %v855_v58 = vsel %vm843_vm3, %v822_v51, %v1846_v24  ;;  %v871_v63 = vsel %vm843_vm3, %v838_v42, %v1847_v21 }
  0xd0   : > { %v1855_v23 = vpop.permute.xlu1 %1854  ;;  %v821_v35 = vsel %vm810_vm2, %v788_v11, %v1831_v15  ;;  %v837_v36 = vsel %vm810_vm2, %v804_v33, %v1832_v5 }
  0xd1   : > { %v1840_v12 = vpop.permute.xlu0 %1839  ;;  %v1857_v40 = vunpack.i.h.bf16 %v1855_v23  ;;  %v1856_v41 = vunpack.i.l.bf16 %v1855_v23 }
  0xd2   : > { %v1842_v18 = vunpack.i.h.bf16 %v1840_v12  ;;  %v1841_v32 = vunpack.i.l.bf16 %v1840_v12 }
  0xd3   : > { %v791_v28 = vsel %vm777_vm1, %v2270_v26, %v1856_v41  ;;  %v807_v29 = vsel %vm777_vm1, %v2265_v17, %v1857_v40 }
  0xd4   : > { %v854_v50 = vsel %vm843_vm3, %v821_v35, %v1841_v32  ;;  %v870_v14 = vsel %vm843_vm3, %v837_v36, %v1842_v18  ;;  %v1865_v46 = vpop.permute.xlu1 %1864 }
  0xd5   : > { %v1850_v9 = vpop.permute.xlu0 %1849  ;;  %1574 = vmatprep.mubr.f32.mxu0 %v854_v50  ;;  %1598 = vmatprep.mubr.f32.mxu1 %v870_v14  ;;  %v1867_v52 = vunpack.i.h.bf16 %v1865_v46  ;;  %v1866_v10 = vunpack.i.l.bf16 %v1865_v46 }
  0xd6   : > { %1575 = vmatmul.mubr.f32.gmra.mxu0 %v855_v58  ;;  %1599 = vmatmul.mubr.f32.gmra.mxu1 %v871_v63  ;;  %v1852_v13 = vunpack.i.h.bf16 %v1850_v9  ;;  %v1851_v49 = vunpack.i.l.bf16 %v1850_v9 }
  0xd7   : > { %v824_v19 = vsel %vm810_vm2, %v791_v28, %v1866_v10  ;;  %v840_v17 = vsel %vm810_vm2, %v807_v29, %v1867_v52 }
  0xd8   : > { %v1875_v39 = vpop.permute.xlu1 %1874  ;;  %v790_v55 = vsel %vm777_vm1, %v2279_v44, %v1851_v49  ;;  %v806_v56 = vsel %vm777_vm1, %v2282_v45, %v1852_v13 }
  0xd9   : > { %v1860_v47 = vpop.permute.xlu0 %1859  ;;  %v1877_v16 = vunpack.i.h.bf16 %v1875_v39  ;;  %v1876_v61 = vunpack.i.l.bf16 %v1875_v39 }
  0xda   : > { %v1862_v53 = vunpack.i.h.bf16 %v1860_v47  ;;  %v1861_v43 = vunpack.i.l.bf16 %v1860_v47 }
  0xdb   : > { %v857_v44 = vsel %vm843_vm3, %v824_v19, %v1876_v61  ;;  %v873_v45 = vsel %vm843_vm3, %v840_v17, %v1877_v16 }
  0xdc   : > { %v1885_v48 = vpop.permute.xlu1 %1884  ;;  %v823_v59 = vsel %vm810_vm2, %v790_v55, %v1861_v43  ;;  %v839_v57 = vsel %vm810_vm2, %v806_v56, %v1862_v53 }
  0xdd   : > { %v1870_v62 = vpop.permute.xlu0 %1869  ;;  %v1887_v22 = vunpack.i.h.bf16 %v1885_v48  ;;  %v1886_v1 = vunpack.i.l.bf16 %v1885_v48 }
  0xde   : > { %v1872_v54 = vunpack.i.h.bf16 %v1870_v62  ;;  %v1871_v34 = vunpack.i.l.bf16 %v1870_v62 }
  0xdf   : > { %v793_v12 = vsel %vm777_vm1, %v2154_v37, %v1886_v1  ;;  %v809_v30 = vsel %vm777_vm1, %v2157_v38, %v1887_v22 }
  0xe0   : > { %v856_v60 = vsel %vm843_vm3, %v823_v59, %v1871_v34  ;;  %v872_v0 = vsel %vm843_vm3, %v839_v57, %v1872_v54  ;;  %v1895_v26 = vpop.permute.xlu1 %1894 }
  0xe1   : > { %v1880_v27 = vpop.permute.xlu0 %1879  ;;  %1577 = vmatprep.mubr.f32.mxu0 %v856_v60  ;;  %1601 = vmatprep.mubr.f32.mxu1 %v872_v0  ;;  %v1897_v20 = vunpack.i.h.bf16 %v1895_v26  ;;  %v1896_v8 = vunpack.i.l.bf16 %v1895_v26 }
  0xe2   : > { %1578 = vmatmul.mubr.f32.gmra.mxu0 %v857_v44  ;;  %1602 = vmatmul.mubr.f32.gmra.mxu1 %v873_v45  ;;  %v1882_v2 = vunpack.i.h.bf16 %v1880_v27  ;;  %v1881_v6 = vunpack.i.l.bf16 %v1880_v27 }
  0xe3   : > { %v826_v50 = vsel %vm810_vm2, %v793_v12, %v1896_v8  ;;  %v842_v38 = vsel %vm810_vm2, %v809_v30, %v1897_v20 }
  0xe4   : > { %v1905_v7 = vpop.permute.xlu1 %1904  ;;  %v792_v32 = vsel %vm777_vm1, %v2301_v3, %v1881_v6  ;;  %v808_v11 = vsel %vm777_vm1, %v2304_v4, %v1882_v2  ;;  %v2475_v4 = vld [vmem:[%s2686_s3] ss:$0 sm:$0xff] }
  0xe5   : > { %v1890_v25 = vpop.permute.xlu0 %1889  ;;  %v1907_v23 = vunpack.i.h.bf16 %v1905_v7  ;;  %v1906_v21 = vunpack.i.l.bf16 %v1905_v7 }
  0xe6   : > { %v1892_v5 = vunpack.i.h.bf16 %v1890_v25  ;;  %v1891_v15 = vunpack.i.l.bf16 %v1890_v25 }
  0xe7   : > { %v859_v14 = vsel %vm843_vm3, %v826_v50, %v1906_v21  ;;  %v875_v3 = vsel %vm843_vm3, %v842_v38, %v1907_v23 }
  0xe8   : > { %v825_v33 = vsel %vm810_vm2, %v792_v32, %v1891_v15  ;;  %v841_v35 = vsel %vm810_vm2, %v808_v11, %v1892_v5 }
  0xe9   : > { %v1900_v24 = vpop.permute.xlu0 %1899 }
  0xea   : > { %v1902_v31 = vunpack.i.h.bf16 %v1900_v24  ;;  %v1901_v18 = vunpack.i.l.bf16 %v1900_v24 }
  0xec   : > { %v858_v36 = vsel %vm843_vm3, %v825_v33, %v1901_v18  ;;  %v874_v37 = vsel %vm843_vm3, %v841_v35, %v1902_v31 }
  0xed   : > { %1580 = vmatprep.mubr.f32.mxu0 %v858_v36  ;;  %1604 = vmatprep.mubr.f32.mxu1 %v874_v37 }
  0xee   : > { %1581 = vmatmul.mubr.f32.gmra.mxu0 %v859_v14  ;;  %1605 = vmatmul.mubr.f32.gmra.mxu1 %v875_v3 }
 0x15a   : > { %v1561_v46 = vpop.f32.mrf.mxu0  ;;  %v1585_v51 = vpop.f32.mrf.mxu1 }
 0x15b   : > { %v971_v42 = vadd.f32 %v1561_v46, %v2475_v4  ;;  %v1051_v9 = vadd.f32 %v1585_v51, %v2475_v4 }
 0x15c   : > { %v965_v58 = vpop.f32.mrf.mxu0  ;;  %v1045_v63 = vpop.f32.mrf.mxu1 }
 0x15d   : > { %1125 = vst.msk [vmem:[%s2480_s24 + $0x8] sm:$0xff] %vm810_vm2, %v971_v42  ;;  %1141 = vst.msk [vmem:[%s2480_s24 + $0x108] sm:$0xff] %vm810_vm2, %v1051_v9  ;;  %v966_v39 = vadd.f32 %v2475_v4, %v965_v58  ;;  %v1046_v40 = vadd.f32 %v2475_v4, %v1045_v63  ;;  %1190 = vrot.lane.b32.xlu1 %v971_v42, %s1932_s19 }
 0x15f   : > { %1124 = vst.msk [vmem:[%s2480_s24] sm:$0xff] %vm810_vm2, %v966_v39  ;;  %1140 = vst.msk [vmem:[%s2480_s24 + $0x100] sm:$0xff] %vm810_vm2, %v1046_v40  ;;  %1188 = vrot.lane.b32.xlu0 %v966_v39, %s1932_s19 }
 0x161   : > { %1222 = vrot.lane.b32.xlu1 %v1051_v9, %s1932_s19 }
 0x163   : > { %1220 = vrot.lane.b32.xlu0 %v1046_v40, %s1932_s19 }
 0x166   : > { %v1564_v41 = vpop.f32.mrf.mxu0  ;;  %v1588_v47 = vpop.f32.mrf.mxu1 }
 0x167   : > { %v981_v13 = vadd.f32 %v1564_v41, %v2475_v4  ;;  %v1061_v49 = vadd.f32 %v1588_v47, %v2475_v4 }
 0x168   : > { %v975_v53 = vpop.f32.mrf.mxu0  ;;  %v1055_v43 = vpop.f32.mrf.mxu1 }
 0x169   : > { %1127 = vst.msk [vmem:[%s2480_s24 + $0x28] sm:$0xff] %vm810_vm2, %v981_v13  ;;  %1143 = vst.msk [vmem:[%s2480_s24 + $0x128] sm:$0xff] %vm810_vm2, %v1061_v49  ;;  %v976_v52 = vadd.f32 %v2475_v4, %v975_v53  ;;  %v1056_v10 = vadd.f32 %v2475_v4, %v1055_v43  ;;  %1194 = vrot.lane.b32.xlu1 %v981_v13, %s1932_s19 }
 0x16b   : > { %1126 = vst.msk [vmem:[%s2480_s24 + $0x20] sm:$0xff] %vm810_vm2, %v976_v52  ;;  %1142 = vst.msk [vmem:[%s2480_s24 + $0x120] sm:$0xff] %vm810_vm2, %v1056_v10  ;;  %1192 = vrot.lane.b32.xlu0 %v976_v52, %s1932_s19 }
 0x16d   : > { %1226 = vrot.lane.b32.xlu1 %v1061_v49, %s1932_s19 }
 0x16f   : > { %1224 = vrot.lane.b32.xlu0 %v1056_v10, %s1932_s19 }
 0x172   : > { %v1567_v48 = vpop.f32.mrf.mxu0  ;;  %v1591_v16 = vpop.f32.mrf.mxu1 }
 0x173   : > { %v991_v61 = vadd.f32 %v1567_v48, %v2475_v4  ;;  %v1071_v62 = vadd.f32 %v1591_v16, %v2475_v4 }
 0x174   : > { %v985_v28 = vpop.f32.mrf.mxu0  ;;  %v1065_v29 = vpop.f32.mrf.mxu1 }
 0x175   : > { %1129 = vst.msk [vmem:[%s2480_s24 + $0x48] sm:$0xff] %vm810_vm2, %v991_v61  ;;  %1145 = vst.msk [vmem:[%s2480_s24 + $0x148] sm:$0xff] %vm810_vm2, %v1071_v62  ;;  %v986_v54 = vadd.f32 %v2475_v4, %v985_v28  ;;  %v1066_v34 = vadd.f32 %v2475_v4, %v1065_v29  ;;  %1198 = vrot.lane.b32.xlu1 %v991_v61, %s1932_s19 }
 0x177   : > { %1128 = vst.msk [vmem:[%s2480_s24 + $0x40] sm:$0xff] %vm810_vm2, %v986_v54  ;;  %1144 = vst.msk [vmem:[%s2480_s24 + $0x140] sm:$0xff] %vm810_vm2, %v1066_v34  ;;  %1196 = vrot.lane.b32.xlu0 %v986_v54, %s1932_s19 }
 0x179   : > { %1230 = vrot.lane.b32.xlu1 %v1071_v62, %s1932_s19 }
 0x17b   : > { %1228 = vrot.lane.b32.xlu0 %v1066_v34, %s1932_s19 }
 0x17e   : > { %v1570_v55 = vpop.f32.mrf.mxu0  ;;  %v1594_v56 = vpop.f32.mrf.mxu1 }
 0x17f   : > { %v1001_v59 = vadd.f32 %v1570_v55, %v2475_v4  ;;  %v1081_v57 = vadd.f32 %v1594_v56, %v2475_v4 }
 0x180   : > { %v995_v60 = vpop.f32.mrf.mxu0  ;;  %v1075_v0 = vpop.f32.mrf.mxu1 }
 0x181   : > { %1131 = vst.msk [vmem:[%s2480_s24 + $0x68] sm:$0xff] %vm810_vm2, %v1001_v59  ;;  %1147 = vst.msk [vmem:[%s2480_s24 + $0x168] sm:$0xff] %vm810_vm2, %v1081_v57  ;;  %v996_v26 = vadd.f32 %v2475_v4, %v995_v60  ;;  %v1076_v19 = vadd.f32 %v2475_v4, %v1075_v0  ;;  %1202 = vrot.lane.b32.xlu1 %v1001_v59, %s1932_s19 }
 0x183   : > { %1130 = vst.msk [vmem:[%s2480_s24 + $0x60] sm:$0xff] %vm810_vm2, %v996_v26  ;;  %1146 = vst.msk [vmem:[%s2480_s24 + $0x160] sm:$0xff] %vm810_vm2, %v1076_v19  ;;  %1200 = vrot.lane.b32.xlu0 %v996_v26, %s1932_s19 }
 0x185   : > { %1234 = vrot.lane.b32.xlu1 %v1081_v57, %s1932_s19 }
 0x187   : > { %1232 = vrot.lane.b32.xlu0 %v1076_v19, %s1932_s19 }
 0x18a   : > { %v1573_v17 = vpop.f32.mrf.mxu0  ;;  %v1597_v27 = vpop.f32.mrf.mxu1 }
 0x18b   : > { %v1011_v44 = vadd.f32 %v1573_v17, %v2475_v4  ;;  %v1091_v45 = vadd.f32 %v1597_v27, %v2475_v4 }
 0x18c   : > { %v1005_v22 = vpop.f32.mrf.mxu0  ;;  %v1085_v1 = vpop.f32.mrf.mxu1 }
 0x18d   : > { %1133 = vst.msk [vmem:[%s2480_s24 + $0x88] sm:$0xff] %vm810_vm2, %v1011_v44  ;;  %1149 = vst.msk [vmem:[%s2480_s24 + $0x188] sm:$0xff] %vm810_vm2, %v1091_v45  ;;  %v1006_v25 = vadd.f32 %v2475_v4, %v1005_v22  ;;  %v1086_v2 = vadd.f32 %v2475_v4, %v1085_v1  ;;  %1206 = vrot.lane.b32.xlu1 %v1011_v44, %s1932_s19 }
 0x18f   : > { %1132 = vst.msk [vmem:[%s2480_s24 + $0x80] sm:$0xff] %vm810_vm2, %v1006_v25  ;;  %1148 = vst.msk [vmem:[%s2480_s24 + $0x180] sm:$0xff] %vm810_vm2, %v1086_v2  ;;  %1204 = vrot.lane.b32.xlu0 %v1006_v25, %s1932_s19 }
 0x191   : > { %1238 = vrot.lane.b32.xlu1 %v1091_v45, %s1932_s19 }
 0x193   : > { %1236 = vrot.lane.b32.xlu0 %v1086_v2, %s1932_s19 }
 0x196   : > { %v1576_v6 = vpop.f32.mrf.mxu0  ;;  %v1600_v7 = vpop.f32.mrf.mxu1 }
 0x197   : > { %v1021_v5 = vadd.f32 %v1576_v6, %v2475_v4  ;;  %v1101_v15 = vadd.f32 %v1600_v7, %v2475_v4 }
 0x198   : > { %v1015_v20 = vpop.f32.mrf.mxu0  ;;  %v1095_v8 = vpop.f32.mrf.mxu1 }
 0x199   : > { %1135 = vst.msk [vmem:[%s2480_s24 + $0xa8] sm:$0xff] %vm810_vm2, %v1021_v5  ;;  %1151 = vst.msk [vmem:[%s2480_s24 + $0x1a8] sm:$0xff] %vm810_vm2, %v1101_v15  ;;  %v1016_v23 = vadd.f32 %v2475_v4, %v1015_v20  ;;  %v1096_v21 = vadd.f32 %v2475_v4, %v1095_v8  ;;  %1210 = vrot.lane.b32.xlu1 %v1021_v5, %s1932_s19 }
 0x19b   : > { %1134 = vst.msk [vmem:[%s2480_s24 + $0xa0] sm:$0xff] %vm810_vm2, %v1016_v23  ;;  %1150 = vst.msk [vmem:[%s2480_s24 + $0x1a0] sm:$0xff] %vm810_vm2, %v1096_v21  ;;  %1208 = vrot.lane.b32.xlu0 %v1016_v23, %s1932_s19 }
 0x19d   : > { %1242 = vrot.lane.b32.xlu1 %v1101_v15, %s1932_s19 }
 0x19f   : > { %1240 = vrot.lane.b32.xlu0 %v1096_v21, %s1932_s19 }
 0x1a2   : > { %v1579_v24 = vpop.f32.mrf.mxu0  ;;  %v1603_v12 = vpop.f32.mrf.mxu1 }
 0x1a3   : > { %v1031_v30 = vadd.f32 %v1579_v24, %v2475_v4  ;;  %v1111_v31 = vadd.f32 %v1603_v12, %v2475_v4 }
 0x1a4   : > { %v1025_v18 = vpop.f32.mrf.mxu0  ;;  %v1105_v32 = vpop.f32.mrf.mxu1 }
 0x1a5   : > { %1137 = vst.msk [vmem:[%s2480_s24 + $0xc8] sm:$0xff] %vm810_vm2, %v1031_v30  ;;  %1153 = vst.msk [vmem:[%s2480_s24 + $0x1c8] sm:$0xff] %vm810_vm2, %v1111_v31  ;;  %v1026_v11 = vadd.f32 %v2475_v4, %v1025_v18  ;;  %v1106_v33 = vadd.f32 %v2475_v4, %v1105_v32  ;;  %1214 = vrot.lane.b32.xlu1 %v1031_v30, %s1932_s19 }
 0x1a7   : > { %1136 = vst.msk [vmem:[%s2480_s24 + $0xc0] sm:$0xff] %vm810_vm2, %v1026_v11  ;;  %1152 = vst.msk [vmem:[%s2480_s24 + $0x1c0] sm:$0xff] %vm810_vm2, %v1106_v33  ;;  %1212 = vrot.lane.b32.xlu0 %v1026_v11, %s1932_s19 }
 0x1a9   : > { %1246 = vrot.lane.b32.xlu1 %v1111_v31, %s1932_s19 }
 0x1ab   : > { %1244 = vrot.lane.b32.xlu0 %v1106_v33, %s1932_s19 }
 0x1ae   : > { %v1582_v35 = vpop.f32.mrf.mxu0  ;;  %v1606_v36 = vpop.f32.mrf.mxu1 }
 0x1af   : > { %v1041_v37 = vadd.f32 %v1582_v35, %v2475_v4  ;;  %v1121_v50 = vadd.f32 %v1606_v36, %v2475_v4 }
 0x1b0   : > { %v1035_v38 = vpop.f32.mrf.mxu0  ;;  %v1115_v14 = vpop.f32.mrf.mxu1 }
 0x1b1   : > { %1139 = vst.msk [vmem:[%s2480_s24 + $0xe8] sm:$0xff] %vm810_vm2, %v1041_v37  ;;  %1155 = vst.msk [vmem:[%s2480_s24 + $0x1e8] sm:$0xff] %vm810_vm2, %v1121_v50  ;;  %v1036_v3 = vadd.f32 %v2475_v4, %v1035_v38  ;;  %v1116_v46 = vadd.f32 %v2475_v4, %v1115_v14  ;;  %1218 = vrot.lane.b32.xlu1 %v1041_v37, %s1932_s19 }
 0x1b3   : > { %1138 = vst.msk [vmem:[%s2480_s24 + $0xe0] sm:$0xff] %vm810_vm2, %v1036_v3  ;;  %1154 = vst.msk [vmem:[%s2480_s24 + $0x1e0] sm:$0xff] %vm810_vm2, %v1116_v46  ;;  %1216 = vrot.lane.b32.xlu0 %v1036_v3, %s1932_s19 }
 0x1b5   : > { %1250 = vrot.lane.b32.xlu1 %v1121_v50, %s1932_s19 }
 0x1b7   : > { %1248 = vrot.lane.b32.xlu0 %v1116_v46, %s1932_s19 }
 0x1cf   : > { %v1191_v51 = vpop.permute.xlu1 %1190 }
 0x1d0   : > { %1445 = vst.msk [vmem:[%s2480_s24 + $0x18] sm:$0xff] %vm810_vm2, %v1191_v51 }
 0x1d1   : > { %v1189_v4 = vpop.permute.xlu0 %1188 }
 0x1d2   : > { %1444 = vst.msk [vmem:[%s2480_s24 + $0x10] sm:$0xff] %vm810_vm2, %v1189_v4 }
 0x1d3   : > { %v1223_v42 = vpop.permute.xlu1 %1222 }
 0x1d4   : > { %1461 = vst.msk [vmem:[%s2480_s24 + $0x118] sm:$0xff] %vm810_vm2, %v1223_v42 }
 0x1d5   : > { %v1221_v9 = vpop.permute.xlu0 %1220 }
 0x1d6   : > { %1460 = vst.msk [vmem:[%s2480_s24 + $0x110] sm:$0xff] %vm810_vm2, %v1221_v9 }
 0x1db   : > { %v1195_v58 = vpop.permute.xlu1 %1194 }
 0x1dc   : > { %1447 = vst.msk [vmem:[%s2480_s24 + $0x38] sm:$0xff] %vm810_vm2, %v1195_v58 }
 0x1dd   : > { %v1193_v63 = vpop.permute.xlu0 %1192 }
 0x1de   : > { %1446 = vst.msk [vmem:[%s2480_s24 + $0x30] sm:$0xff] %vm810_vm2, %v1193_v63 }
 0x1df   : > { %v1227_v39 = vpop.permute.xlu1 %1226 }
 0x1e0   : > { %1463 = vst.msk [vmem:[%s2480_s24 + $0x138] sm:$0xff] %vm810_vm2, %v1227_v39 }
 0x1e1   : > { %v1225_v40 = vpop.permute.xlu0 %1224 }
 0x1e2   : > { %1462 = vst.msk [vmem:[%s2480_s24 + $0x130] sm:$0xff] %vm810_vm2, %v1225_v40 }
 0x1e7   : > { %v1199_v41 = vpop.permute.xlu1 %1198 }
 0x1e8   : > { %1449 = vst.msk [vmem:[%s2480_s24 + $0x58] sm:$0xff] %vm810_vm2, %v1199_v41 }
 0x1e9   : > { %v1197_v47 = vpop.permute.xlu0 %1196 }
 0x1ea   : > { %1448 = vst.msk [vmem:[%s2480_s24 + $0x50] sm:$0xff] %vm810_vm2, %v1197_v47 }
 0x1eb   : > { %v1231_v13 = vpop.permute.xlu1 %1230 }
 0x1ec   : > { %1465 = vst.msk [vmem:[%s2480_s24 + $0x158] sm:$0xff] %vm810_vm2, %v1231_v13 }
 0x1ed   : > { %v1229_v49 = vpop.permute.xlu0 %1228 }
 0x1ee   : > { %1464 = vst.msk [vmem:[%s2480_s24 + $0x150] sm:$0xff] %vm810_vm2, %v1229_v49 }
 0x1f3   : > { %v1203_v53 = vpop.permute.xlu1 %1202 }
 0x1f4   : > { %1451 = vst.msk [vmem:[%s2480_s24 + $0x78] sm:$0xff] %vm810_vm2, %v1203_v53 }
 0x1f5   : > { %v1201_v43 = vpop.permute.xlu0 %1200 }
 0x1f6   : > { %1450 = vst.msk [vmem:[%s2480_s24 + $0x70] sm:$0xff] %vm810_vm2, %v1201_v43 }
 0x1f7   : > { %v1235_v52 = vpop.permute.xlu1 %1234 }
 0x1f8   : > { %1467 = vst.msk [vmem:[%s2480_s24 + $0x178] sm:$0xff] %vm810_vm2, %v1235_v52 }
 0x1f9   : > { %v1233_v10 = vpop.permute.xlu0 %1232 }
 0x1fa   : > { %1466 = vst.msk [vmem:[%s2480_s24 + $0x170] sm:$0xff] %vm810_vm2, %v1233_v10 }
 0x1ff   : > { %v1207_v48 = vpop.permute.xlu1 %1206 }
 0x200   : > { %1453 = vst.msk [vmem:[%s2480_s24 + $0x98] sm:$0xff] %vm810_vm2, %v1207_v48 }
 0x201   : > { %v1205_v16 = vpop.permute.xlu0 %1204 }
 0x202   : > { %1452 = vst.msk [vmem:[%s2480_s24 + $0x90] sm:$0xff] %vm810_vm2, %v1205_v16 }
 0x203   : > { %v1239_v61 = vpop.permute.xlu1 %1238 }
 0x204   : > { %1469 = vst.msk [vmem:[%s2480_s24 + $0x198] sm:$0xff] %vm810_vm2, %v1239_v61 }
 0x205   : > { %v1237_v62 = vpop.permute.xlu0 %1236 }
 0x206   : > { %1468 = vst.msk [vmem:[%s2480_s24 + $0x190] sm:$0xff] %vm810_vm2, %v1237_v62 }
 0x20b   : > { %v1211_v28 = vpop.permute.xlu1 %1210 }
 0x20c   : > { %1455 = vst.msk [vmem:[%s2480_s24 + $0xb8] sm:$0xff] %vm810_vm2, %v1211_v28 }
 0x20d   : > { %v1209_v29 = vpop.permute.xlu0 %1208 }
 0x20e   : > { %1454 = vst.msk [vmem:[%s2480_s24 + $0xb0] sm:$0xff] %vm810_vm2, %v1209_v29 }
 0x20f   : > { %v1243_v54 = vpop.permute.xlu1 %1242 }
 0x210   : > { %1471 = vst.msk [vmem:[%s2480_s24 + $0x1b8] sm:$0xff] %vm810_vm2, %v1243_v54 }
 0x211   : > { %v1241_v34 = vpop.permute.xlu0 %1240 }
 0x212   : > { %1470 = vst.msk [vmem:[%s2480_s24 + $0x1b0] sm:$0xff] %vm810_vm2, %v1241_v34 }
 0x217   : > { %v1215_v55 = vpop.permute.xlu1 %1214 }
 0x218   : > { %1457 = vst.msk [vmem:[%s2480_s24 + $0xd8] sm:$0xff] %vm810_vm2, %v1215_v55 }
 0x219   : > { %v1213_v56 = vpop.permute.xlu0 %1212 }
 0x21a   : > { %1456 = vst.msk [vmem:[%s2480_s24 + $0xd0] sm:$0xff] %vm810_vm2, %v1213_v56 }
 0x21b   : > { %v1247_v59 = vpop.permute.xlu1 %1246 }
 0x21c   : > { %1473 = vst.msk [vmem:[%s2480_s24 + $0x1d8] sm:$0xff] %vm810_vm2, %v1247_v59 }
 0x21d   : > { %v1245_v57 = vpop.permute.xlu0 %1244 }
 0x21e   : > { %1472 = vst.msk [vmem:[%s2480_s24 + $0x1d0] sm:$0xff] %vm810_vm2, %v1245_v57 }
 0x223   : > { %v1219_v60 = vpop.permute.xlu1 %1218 }
 0x224   : > { %1459 = vst.msk [vmem:[%s2480_s24 + $0xf8] sm:$0xff] %vm810_vm2, %v1219_v60 }
 0x225   : > { %v1217_v0 = vpop.permute.xlu0 %1216 }
 0x226   : > { %1458 = vst.msk [vmem:[%s2480_s24 + $0xf0] sm:$0xff] %vm810_vm2, %v1217_v0 }
 0x227   : > { %v1251_v26 = vpop.permute.xlu1 %1250 }
 0x228   : > { %1475 = vst.msk [vmem:[%s2480_s24 + $0x1f8] sm:$0xff] %vm810_vm2, %v1251_v26 }
 0x229   : > { %v1249_v19 = vpop.permute.xlu0 %1248 }
 0x22a   : > { %1474 = vst.msk [vmem:[%s2480_s24 + $0x1f0] sm:$0xff] %vm810_vm2, %v1249_v19 }
 0x22b PF: > { %s14_s17 = sadd.s32 1, %s1930_s17   ;;  %s2688_s15 = smov %s1926_s16 }
 0x22c   : > { %p11_p5 = scmp.ge.s32.totalorder %s14_s17, 4   ;;  %s2689_s16 = smov %s2691_s18 }
 0x22e   :  { %13 = sbr.rel (!%p11_p5) target bundleno = 2 (0x2), region = 70 }

</bundles_post_ra>
